<compile_context>
chip_gen: v5e
topology: v5e:2x2
jax: 0.10.0
libtpu: 0.0.40
codegen_flags: <defaults>
</compile_context>

<pallas_src>
import functools

import jax
import jax.numpy as jnp
from jax import lax
from jax.experimental import pallas as pl
from jax.experimental.pallas import tpu as pltpu


# ----------------------------------------------------------------------------
# Pallas kernel (per time block of the 1-D grid):
#   emb_ref : (T_blk*B, E)  bf16  time-major embedded inputs for this block
#   w_ih_ref: (E, 3H)       bf16  input->gates weights  (gate order: r, z, n)
#   w_hh_ref: (H, 3H)       bf16  hidden->gates weights (gate order: r, z, n)
#   b_ih_ref: (1, 3H)       f32
#   b_hh_ref: (1, 3H)       f32
#   fc_w_ref: (H, C_pad)    bf16  (zero-padded columns)
#   fc_b_ref: (1, C_pad)    f32
#   out_ref : (B, C_pad)    f32   logits (written on last grid step)
#   h_scr   : (B, H)        f32   hidden state carried across grid steps
#   gi_scr  : (T_blk*B, 3H) f32   hoisted input projection for this block
# ----------------------------------------------------------------------------
def gru_fc_kernel(emb_ref, w_ih_ref, w_hh_ref, b_ih_ref, b_hh_ref,
                  fc_w_ref, fc_b_ref, out_ref, h_scr, gi_scr,
                  *, t_valid, t_padded):
    tb = pl.program_id(0)
    n_tb = pl.num_programs(0)
    B, H = h_scr.shape
    t_blk = gi_scr.shape[0] // B
    mask_tail = t_padded > t_valid  # static Python bool

    @pl.when(tb == 0)
    def _():
        h_scr[...] = jnp.zeros_like(h_scr)

    # Hoisted input projection: one large MXU matmul for the whole time block
    # (T_blk*B rows) instead of T tiny B-row matmuls inside the recurrence.
    gi_scr[...] = (
        jnp.dot(emb_ref[...], w_ih_ref[...], preferred_element_type=jnp.float32)
        + b_ih_ref[...]
    )

    w_hh = w_hh_ref[...]          # (H, 3H) bf16, loaded once
    b_hh = b_hh_ref[...]          # (1, 3H) f32

    def step(t, h):
        row0 = pl.multiple_of(t * B, B)
        gi = gi_scr[pl.ds(row0, B), :]                          # (B, 3H) f32
        gh = jnp.dot(h.astype(w_hh.dtype), w_hh,
                     preferred_element_type=jnp.float32) + b_hh  # (B, 3H) f32
        # PyTorch GRU gate order: r, z, n
        r = jax.nn.sigmoid(gi[:, 0 * H:1 * H] + gh[:, 0 * H:1 * H])
        z = jax.nn.sigmoid(gi[:, 1 * H:2 * H] + gh[:, 1 * H:2 * H])
        n = jnp.tanh(gi[:, 2 * H:3 * H] + r * gh[:, 2 * H:3 * H])
        h_new = (1.0 - z) * n + z * h
        if mask_tail:
            t_global = tb * t_blk + t
            h_new = jnp.where(t_global < t_valid, h_new, h)
        return h_new

    unroll = True if t_blk <= 32 else 4
    h = lax.fori_loop(0, t_blk, step, h_scr[...], unroll=unroll)
    h_scr[...] = h

    @pl.when(tb == n_tb - 1)
    def _():
        # hid.view(...).mean(dim=(0,1)) == h_T for n_layers=1, unidirectional;
        # dropout(p=0) is identity.  Lane-dense (C_pad=128) output store.
        out_ref[...] = (
            jnp.dot(h.astype(fc_w_ref.dtype), fc_w_ref[...],
                    preferred_element_type=jnp.float32) + fc_b_ref[...]
        )


def student_forward(input_ids, params, *, t_blk=None, compute_dtype=jnp.bfloat16):
    """input_ids: (B, T) int32. Returns logits (B, n_classes) f32."""
    emb_table = params["embedding"]              # (vocab, E)
    w_ih = params["w_ih"]                        # (3H, E)  -- PyTorch layout
    w_hh = params["w_hh"]                        # (3H, H)
    b_ih = params["b_ih"]                        # (3H,)
    b_hh = params["b_hh"]                        # (3H,)
    fc_w = params["fc_w"]                        # (C, H)
    fc_b = params["fc_b"]                        # (C,)

    B, T = input_ids.shape
    E = emb_table.shape[1]
    H = w_hh.shape[1]
    C = fc_w.shape[0]

    # Padding: batch to the f32 sublane multiple, FC output to lane-dense 128.
    B_pad = max(8, -(-B // 8) * 8)
    C_pad = max(128, -(-C // 128) * 128)

    if t_blk is None:
        t_blk = T if T <= 128 else 128
    n_tb = -(-T // t_blk)
    T_pad = n_tb * t_blk

    # Embedding gather (XLA), directly time-major; pad batch/time with id 0
    # (padded batch rows are sliced off; padded time steps masked in-kernel).
    ids_tb = jnp.transpose(input_ids)                              # (T, B)
    ids_tb = jnp.pad(ids_tb, ((0, T_pad - T), (0, B_pad - B)))     # (T_pad, B_pad)
    emb2d = emb_table[ids_tb].reshape(T_pad * B_pad, E).astype(compute_dtype)

    # Pre-transpose weights to (in, out); matmul operands in bf16, biases f32.
    w_ih_t = w_ih.T.astype(compute_dtype)                          # (E, 3H)
    w_hh_t = w_hh.T.astype(compute_dtype)                          # (H, 3H)
    fc_w_t = jnp.pad(fc_w.T, ((0, 0), (0, C_pad - C))).astype(compute_dtype)
    fc_b_p = jnp.pad(fc_b, (0, C_pad - C)).reshape(1, C_pad).astype(jnp.float32)
    b_ih_2 = b_ih.reshape(1, -1).astype(jnp.float32)
    b_hh_2 = b_hh.reshape(1, -1).astype(jnp.float32)

    # VMEM budget: resident weights + double-buffered emb block + scratch + out.
    bpe = jnp.dtype(compute_dtype).itemsize
    vmem_bytes = (
        (w_ih_t.size + w_hh_t.size + fc_w_t.size) * bpe
        + (b_ih_2.size + b_hh_2.size + fc_b_p.size) * 4
        + 2 * (t_blk * B_pad * E) * bpe            # double-buffered emb block
        + (t_blk * B_pad * 3 * H + B_pad * H) * 4  # gi + h scratch
        + 2 * B_pad * C_pad * 4                    # out
    )
    vmem_limit = int(min(96 << 20, vmem_bytes + (8 << 20)))

    kernel = functools.partial(gru_fc_kernel, t_valid=T, t_padded=T_pad)

    out = pl.pallas_call(
        kernel,
        out_shape=jax.ShapeDtypeStruct((B_pad, C_pad), jnp.float32),
        grid_spec=pltpu.PrefetchScalarGridSpec(
            num_scalar_prefetch=0,
            grid=(n_tb,),
            in_specs=[
                pl.BlockSpec((t_blk * B_pad, E), lambda tb: (tb, 0)),  # streamed
                pl.BlockSpec((E, 3 * H), lambda tb: (0, 0)),           # resident
                pl.BlockSpec((H, 3 * H), lambda tb: (0, 0)),
                pl.BlockSpec((1, 3 * H), lambda tb: (0, 0)),
                pl.BlockSpec((1, 3 * H), lambda tb: (0, 0)),
                pl.BlockSpec((H, C_pad), lambda tb: (0, 0)),
                pl.BlockSpec((1, C_pad), lambda tb: (0, 0)),
            ],
            out_specs=pl.BlockSpec((B_pad, C_pad), lambda tb: (0, 0)),
            scratch_shapes=[
                pltpu.VMEM((B_pad, H), jnp.float32),                 # h carry
                pltpu.VMEM((t_blk * B_pad, 3 * H), jnp.float32),     # gi block
            ],
        ),
        compiler_params=pltpu.CompilerParams(
            dimension_semantics=("arbitrary",),   # time is a serial recurrence
            vmem_limit_bytes=vmem_limit,
        ),
    )(emb2d, w_ih_t, w_hh_t, b_ih_2, b_hh_2, fc_w_t, fc_b_p)

    return out[:B, :C]


# ----------------------------------------------------------------------------
# Pure-JAX reference (mirrors torch.nn.GRU + Linear).  matmul_dtype=bfloat16
# reproduces the kernel's MXU input precision (f32 accumulate) exactly.
# ----------------------------------------------------------------------------
def student_forward_ref(input_ids, params, *, matmul_dtype=jnp.float32):
    f32 = jnp.float32

    def mm(a, b):
        a = a.astype(matmul_dtype).astype(f32)
        b = b.astype(matmul_dtype).astype(f32)
        return jnp.dot(a, b, preferred_element_type=f32)

    emb = params["embedding"][input_ids].astype(f32)               # (B, T, E)
    H = params["w_hh"].shape[1]
    w_ih_t, w_hh_t = params["w_ih"].T, params["w_hh"].T
    b_ih, b_hh = params["b_ih"], params["b_hh"]

    def cell(h, x_t):
        gi = mm(x_t, w_ih_t) + b_ih
        gh = mm(h, w_hh_t) + b_hh
        r = jax.nn.sigmoid(gi[:, :H] + gh[:, :H])
        z = jax.nn.sigmoid(gi[:, H:2 * H] + gh[:, H:2 * H])
        n = jnp.tanh(gi[:, 2 * H:] + r * gh[:, 2 * H:])
        return (1.0 - z) * n + z * h, None

    h0 = jnp.zeros((emb.shape[0], H), f32)
    hT, _ = lax.scan(cell, h0, jnp.transpose(emb, (1, 0, 2)))
    return mm(hT, params["fc_w"].T) + params["fc_b"]


def init_params(key, vocab, emb_dim, hidden_dim, n_classes):
    ks = jax.random.split(key, 7)
    s = 1.0 / jnp.sqrt(hidden_dim)
    return {
        "embedding": jax.random.normal(ks[0], (vocab, emb_dim), jnp.float32),
        "w_ih": jax.random.uniform(ks[1], (3 * hidden_dim, emb_dim), jnp.float32, -s, s),
        "w_hh": jax.random.uniform(ks[2], (3 * hidden_dim, hidden_dim), jnp.float32, -s, s),
        "b_ih": jax.random.uniform(ks[3], (3 * hidden_dim,), jnp.float32, -s, s),
        "b_hh": jax.random.uniform(ks[4], (3 * hidden_dim,), jnp.float32, -s, s),
        "fc_w": jax.random.uniform(ks[5], (n_classes, hidden_dim), jnp.float32, -s, s),
        "fc_b": jax.random.uniform(ks[6], (n_classes,), jnp.float32, -s, s),
    }


if __name__ == "__main__":
    # Small shapes consistent with the module defaults (n_layers=1, bidirect=False).
    VOCAB, EMB_DIM, HIDDEN_DIM, N_CLASSES = 50, 128, 128, 4
    BATCH, SEQ = 2, 8

    key = jax.random.PRNGKey(0)
    k_params, k_ids = jax.random.split(key)
    params = init_params(k_params, VOCAB, EMB_DIM, HIDDEN_DIM, N_CLASSES)
    input_ids = jax.random.randint(k_ids, (BATCH, SEQ), 0, VOCAB, jnp.int32)

    fwd = jax.jit(functools.partial(student_forward, params=params))
    logits = jax.block_until_ready(fwd(input_ids))

    ref_bf16 = jax.block_until_ready(
        student_forward_ref(input_ids, params, matmul_dtype=jnp.bfloat16))
    ref_f32 = jax.block_until_ready(
        student_forward_ref(input_ids, params, matmul_dtype=jnp.float32))

    assert logits.shape == (BATCH, N_CLASSES)
    # Tight check against the precision-matched (bf16 MXU inputs) reference.
    assert jnp.allclose(logits, ref_bf16, rtol=2e-3, atol=2e-3), (logits, ref_bf16)
    # Loose check against the exact f32 reference (bf16 input rounding only).
    assert jnp.allclose(logits, ref_f32, rtol=5e-2, atol=5e-2), (logits, ref_f32)

    print("KERNEL_OK")
</pallas_src>

<mosaic_0001>
module attributes {stable_mosaic.version = 11 : i64} {
  func.func @gru_fc_kernel(%arg0: i32, %arg1: memref<64x128xbf16, #tpu.memory_space<vmem>>, %arg2: memref<128x384xbf16, #tpu.memory_space<vmem>>, %arg3: memref<128x384xbf16, #tpu.memory_space<vmem>>, %arg4: memref<1x384xf32, #tpu.memory_space<vmem>>, %arg5: memref<1x384xf32, #tpu.memory_space<vmem>>, %arg6: memref<128x128xbf16, #tpu.memory_space<vmem>>, %arg7: memref<1x128xf32, #tpu.memory_space<vmem>>, %arg8: memref<8x128xf32, #tpu.memory_space<vmem>>, %arg9: memref<8x128xf32, #tpu.memory_space<vmem>>, %arg10: memref<64x384xf32, #tpu.memory_space<vmem>>) attributes {dimension_semantics = [#tpu.dimension_semantics<arbitrary>], iteration_bounds = array<i64: 1>, scalar_prefetch = 0 : i64, scratch_operands = 2 : i64, tpu.core_type = #tpu.core_type<tc>, window_params = [{transform_indices = @transform_0, window_bounds = array<i64: 64, 128>}, {pipeline_mode = #tpu.pipeline_mode<synchronous>, transform_indices = @transform_1, window_bounds = array<i64: 128, 384>}, {pipeline_mode = #tpu.pipeline_mode<synchronous>, transform_indices = @transform_2, window_bounds = array<i64: 128, 384>}, {pipeline_mode = #tpu.pipeline_mode<synchronous>, transform_indices = @transform_3, window_bounds = array<i64: 1, 384>}, {pipeline_mode = #tpu.pipeline_mode<synchronous>, transform_indices = @transform_4, window_bounds = array<i64: 1, 384>}, {pipeline_mode = #tpu.pipeline_mode<synchronous>, transform_indices = @transform_5, window_bounds = array<i64: 128, 128>}, {pipeline_mode = #tpu.pipeline_mode<synchronous>, transform_indices = @transform_6, window_bounds = array<i64: 1, 128>}, {pipeline_mode = #tpu.pipeline_mode<synchronous>, transform_indices = @transform_7, window_bounds = array<i64: 8, 128>}]} {
    %c0_i32 = arith.constant 0 : i32
    %0 = arith.cmpi eq, %arg0, %c0_i32 : i32
    %1 = arith.extui %0 : i1 to i32
    %c0_i32_0 = arith.constant 0 : i32
    %2 = arith.cmpi ne, %1, %c0_i32_0 : i32
    scf.if %2 {
      %cst_67 = arith.constant 0.000000e+00 : f32
      %289 = vector.broadcast %cst_67 : f32 to vector<8x128xf32>
      %c0_68 = arith.constant 0 : index
      %c0_69 = arith.constant 0 : index
      %290 = vector.load %arg9[%c0_68, %c0_69] : memref<8x128xf32, #tpu.memory_space<vmem>>, vector<8x128xf32>
      tpu.vector_store %arg9[%c0_68, %c0_69], %289 {strides = array<i32>} : memref<8x128xf32, #tpu.memory_space<vmem>>, vector<8x128xf32>,
    } else {
    }
    %c0 = arith.constant 0 : index
    %c0_1 = arith.constant 0 : index
    %3 = vector.load %arg1[%c0, %c0_1] : memref<64x128xbf16, #tpu.memory_space<vmem>>, vector<64x128xbf16>
    %c0_2 = arith.constant 0 : index
    %c0_3 = arith.constant 0 : index
    %4 = vector.load %arg2[%c0_2, %c0_3] : memref<128x384xbf16, #tpu.memory_space<vmem>>, vector<128x384xbf16>
    %cst = arith.constant dense<0.000000e+00> : vector<64x384xf32>
    %5 = tpu.matmul %3, %4, %cst {dimension_numbers = #tpu.dot_dimension_numbers<[1], [0], [0], [1], [0, 0, 1, 1], [], []>} : vector<64x128xbf16>, vector<128x384xbf16>, vector<64x384xf32> -> vector<64x384xf32>
    %c0_4 = arith.constant 0 : index
    %c0_5 = arith.constant 0 : index
    %6 = vector.load %arg4[%c0_4, %c0_5] : memref<1x384xf32, #tpu.memory_space<vmem>>, vector<1x384xf32>
    %7 = vector.broadcast %6 : vector<1x384xf32> to vector<64x384xf32>
    %8 = arith.addf %5, %7 : vector<64x384xf32>
    %c0_6 = arith.constant 0 : index
    %c0_7 = arith.constant 0 : index
    %9 = vector.load %arg10[%c0_6, %c0_7] : memref<64x384xf32, #tpu.memory_space<vmem>>, vector<64x384xf32>
    tpu.vector_store %arg10[%c0_6, %c0_7], %8 {strides = array<i32>} : memref<64x384xf32, #tpu.memory_space<vmem>>, vector<64x384xf32>,
    %c0_8 = arith.constant 0 : index
    %c0_9 = arith.constant 0 : index
    %10 = vector.load %arg3[%c0_8, %c0_9] : memref<128x384xbf16, #tpu.memory_space<vmem>>, vector<128x384xbf16>
    %c0_10 = arith.constant 0 : index
    %c0_11 = arith.constant 0 : index
    %11 = vector.load %arg5[%c0_10, %c0_11] : memref<1x384xf32, #tpu.memory_space<vmem>>, vector<1x384xf32>
    %c0_12 = arith.constant 0 : index
    %c0_13 = arith.constant 0 : index
    %12 = vector.load %arg9[%c0_12, %c0_13] : memref<8x128xf32, #tpu.memory_space<vmem>>, vector<8x128xf32>
    %c0_i32_14 = arith.constant 0 : i32
    %c8_i32 = arith.constant 8 : i32
    %13 = arith.muli %c0_i32_14, %c8_i32 : i32
    %14 = tpu.assume_multiple %13, 8 : i32
    %15 = arith.index_cast %14 : i32 to index
    %c0_15 = arith.constant 0 : index
    %16 = vector.load %arg10[%15, %c0_15] : memref<64x384xf32, #tpu.memory_space<vmem>>, vector<8x384xf32>
    %17 = arith.truncf %12 : vector<8x128xf32> to vector<8x128xbf16>
    %cst_16 = arith.constant dense<0.000000e+00> : vector<8x384xf32>
    %18 = tpu.matmul %17, %10, %cst_16 {dimension_numbers = #tpu.dot_dimension_numbers<[1], [0], [0], [1], [0, 0, 1, 1], [], []>} : vector<8x128xbf16>, vector<128x384xbf16>, vector<8x384xf32> -> vector<8x384xf32>
    %19 = vector.broadcast %11 : vector<1x384xf32> to vector<8x384xf32>
    %20 = arith.addf %18, %19 : vector<8x384xf32>
    %21 = vector.extract_strided_slice %16 {offsets = [0, 0], sizes = [8, 128], strides = [1, 1]} : vector<8x384xf32> to vector<8x128xf32>
    %22 = vector.extract_strided_slice %20 {offsets = [0, 0], sizes = [8, 128], strides = [1, 1]} : vector<8x384xf32> to vector<8x128xf32>
    %23 = arith.addf %21, %22 : vector<8x128xf32>
    %24 = arith.negf %23 : vector<8x128xf32>
    %25 = math.exp %24 : vector<8x128xf32>
    %cst_17 = arith.constant 1.000000e+00 : f32
    %26 = vector.broadcast %cst_17 : f32 to vector<8x128xf32>
    %27 = arith.addf %26, %25 : vector<8x128xf32>
    %28 = arith.divf %26, %27 : vector<8x128xf32>
    %29 = vector.extract_strided_slice %16 {offsets = [0, 128], sizes = [8, 128], strides = [1, 1]} : vector<8x384xf32> to vector<8x128xf32>
    %30 = vector.extract_strided_slice %20 {offsets = [0, 128], sizes = [8, 128], strides = [1, 1]} : vector<8x384xf32> to vector<8x128xf32>
    %31 = arith.addf %29, %30 : vector<8x128xf32>
    %32 = arith.negf %31 : vector<8x128xf32>
    %33 = math.exp %32 : vector<8x128xf32>
    %cst_18 = arith.constant 1.000000e+00 : f32
    %34 = vector.broadcast %cst_18 : f32 to vector<8x128xf32>
    %35 = arith.addf %34, %33 : vector<8x128xf32>
    %36 = arith.divf %34, %35 : vector<8x128xf32>
    %37 = vector.extract_strided_slice %16 {offsets = [0, 256], sizes = [8, 128], strides = [1, 1]} : vector<8x384xf32> to vector<8x128xf32>
    %38 = vector.extract_strided_slice %20 {offsets = [0, 256], sizes = [8, 128], strides = [1, 1]} : vector<8x384xf32> to vector<8x128xf32>
    %39 = arith.mulf %28, %38 : vector<8x128xf32>
    %40 = arith.addf %37, %39 : vector<8x128xf32>
    %41 = math.tanh %40 : vector<8x128xf32>
    %cst_19 = arith.constant 1.000000e+00 : f32
    %42 = vector.broadcast %cst_19 : f32 to vector<8x128xf32>
    %43 = arith.subf %42, %36 : vector<8x128xf32>
    %44 = arith.mulf %43, %41 : vector<8x128xf32>
    %45 = arith.mulf %36, %12 : vector<8x128xf32>
    %46 = arith.addf %44, %45 : vector<8x128xf32>
    %c1_i32 = arith.constant 1 : i32
    %c8_i32_20 = arith.constant 8 : i32
    %47 = arith.muli %c1_i32, %c8_i32_20 : i32
    %48 = tpu.assume_multiple %47, 8 : i32
    %49 = arith.index_cast %48 : i32 to index
    %c0_21 = arith.constant 0 : index
    %50 = vector.load %arg10[%49, %c0_21] : memref<64x384xf32, #tpu.memory_space<vmem>>, vector<8x384xf32>
    %51 = arith.truncf %46 : vector<8x128xf32> to vector<8x128xbf16>
    %cst_22 = arith.constant dense<0.000000e+00> : vector<8x384xf32>
    %52 = tpu.matmul %51, %10, %cst_22 {dimension_numbers = #tpu.dot_dimension_numbers<[1], [0], [0], [1], [0, 0, 1, 1], [], []>} : vector<8x128xbf16>, vector<128x384xbf16>, vector<8x384xf32> -> vector<8x384xf32>
    %53 = vector.broadcast %11 : vector<1x384xf32> to vector<8x384xf32>
    %54 = arith.addf %52, %53 : vector<8x384xf32>
    %55 = vector.extract_strided_slice %50 {offsets = [0, 0], sizes = [8, 128], strides = [1, 1]} : vector<8x384xf32> to vector<8x128xf32>
    %56 = vector.extract_strided_slice %54 {offsets = [0, 0], sizes = [8, 128], strides = [1, 1]} : vector<8x384xf32> to vector<8x128xf32>
    %57 = arith.addf %55, %56 : vector<8x128xf32>
    %58 = arith.negf %57 : vector<8x128xf32>
    %59 = math.exp %58 : vector<8x128xf32>
    %cst_23 = arith.constant 1.000000e+00 : f32
    %60 = vector.broadcast %cst_23 : f32 to vector<8x128xf32>
    %61 = arith.addf %60, %59 : vector<8x128xf32>
    %62 = arith.divf %60, %61 : vector<8x128xf32>
    %63 = vector.extract_strided_slice %50 {offsets = [0, 128], sizes = [8, 128], strides = [1, 1]} : vector<8x384xf32> to vector<8x128xf32>
    %64 = vector.extract_strided_slice %54 {offsets = [0, 128], sizes = [8, 128], strides = [1, 1]} : vector<8x384xf32> to vector<8x128xf32>
    %65 = arith.addf %63, %64 : vector<8x128xf32>
    %66 = arith.negf %65 : vector<8x128xf32>
    %67 = math.exp %66 : vector<8x128xf32>
    %cst_24 = arith.constant 1.000000e+00 : f32
    %68 = vector.broadcast %cst_24 : f32 to vector<8x128xf32>
    %69 = arith.addf %68, %67 : vector<8x128xf32>
    %70 = arith.divf %68, %69 : vector<8x128xf32>
    %71 = vector.extract_strided_slice %50 {offsets = [0, 256], sizes = [8, 128], strides = [1, 1]} : vector<8x384xf32> to vector<8x128xf32>
    %72 = vector.extract_strided_slice %54 {offsets = [0, 256], sizes = [8, 128], strides = [1, 1]} : vector<8x384xf32> to vector<8x128xf32>
    %73 = arith.mulf %62, %72 : vector<8x128xf32>
    %74 = arith.addf %71, %73 : vector<8x128xf32>
    %75 = math.tanh %74 : vector<8x128xf32>
    %cst_25 = arith.constant 1.000000e+00 : f32
    %76 = vector.broadcast %cst_25 : f32 to vector<8x128xf32>
    %77 = arith.subf %76, %70 : vector<8x128xf32>
    %78 = arith.mulf %77, %75 : vector<8x128xf32>
    %79 = arith.mulf %70, %46 : vector<8x128xf32>
    %80 = arith.addf %78, %79 : vector<8x128xf32>
    %c2_i32 = arith.constant 2 : i32
    %c8_i32_26 = arith.constant 8 : i32
    %81 = arith.muli %c2_i32, %c8_i32_26 : i32
    %82 = tpu.assume_multiple %81, 8 : i32
    %83 = arith.index_cast %82 : i32 to index
    %c0_27 = arith.constant 0 : index
    %84 = vector.load %arg10[%83, %c0_27] : memref<64x384xf32, #tpu.memory_space<vmem>>, vector<8x384xf32>
    %85 = arith.truncf %80 : vector<8x128xf32> to vector<8x128xbf16>
    %cst_28 = arith.constant dense<0.000000e+00> : vector<8x384xf32>
    %86 = tpu.matmul %85, %10, %cst_28 {dimension_numbers = #tpu.dot_dimension_numbers<[1], [0], [0], [1], [0, 0, 1, 1], [], []>} : vector<8x128xbf16>, vector<128x384xbf16>, vector<8x384xf32> -> vector<8x384xf32>
    %87 = vector.broadcast %11 : vector<1x384xf32> to vector<8x384xf32>
    %88 = arith.addf %86, %87 : vector<8x384xf32>
    %89 = vector.extract_strided_slice %84 {offsets = [0, 0], sizes = [8, 128], strides = [1, 1]} : vector<8x384xf32> to vector<8x128xf32>
    %90 = vector.extract_strided_slice %88 {offsets = [0, 0], sizes = [8, 128], strides = [1, 1]} : vector<8x384xf32> to vector<8x128xf32>
    %91 = arith.addf %89, %90 : vector<8x128xf32>
    %92 = arith.negf %91 : vector<8x128xf32>
    %93 = math.exp %92 : vector<8x128xf32>
    %cst_29 = arith.constant 1.000000e+00 : f32
    %94 = vector.broadcast %cst_29 : f32 to vector<8x128xf32>
    %95 = arith.addf %94, %93 : vector<8x128xf32>
    %96 = arith.divf %94, %95 : vector<8x128xf32>
    %97 = vector.extract_strided_slice %84 {offsets = [0, 128], sizes = [8, 128], strides = [1, 1]} : vector<8x384xf32> to vector<8x128xf32>
    %98 = vector.extract_strided_slice %88 {offsets = [0, 128], sizes = [8, 128], strides = [1, 1]} : vector<8x384xf32> to vector<8x128xf32>
    %99 = arith.addf %97, %98 : vector<8x128xf32>
    %100 = arith.negf %99 : vector<8x128xf32>
    %101 = math.exp %100 : vector<8x128xf32>
    %cst_30 = arith.constant 1.000000e+00 : f32
    %102 = vector.broadcast %cst_30 : f32 to vector<8x128xf32>
    %103 = arith.addf %102, %101 : vector<8x128xf32>
    %104 = arith.divf %102, %103 : vector<8x128xf32>
    %105 = vector.extract_strided_slice %84 {offsets = [0, 256], sizes = [8, 128], strides = [1, 1]} : vector<8x384xf32> to vector<8x128xf32>
    %106 = vector.extract_strided_slice %88 {offsets = [0, 256], sizes = [8, 128], strides = [1, 1]} : vector<8x384xf32> to vector<8x128xf32>
    %107 = arith.mulf %96, %106 : vector<8x128xf32>
    %108 = arith.addf %105, %107 : vector<8x128xf32>
    %109 = math.tanh %108 : vector<8x128xf32>
    %cst_31 = arith.constant 1.000000e+00 : f32
    %110 = vector.broadcast %cst_31 : f32 to vector<8x128xf32>
    %111 = arith.subf %110, %104 : vector<8x128xf32>
    %112 = arith.mulf %111, %109 : vector<8x128xf32>
    %113 = arith.mulf %104, %80 : vector<8x128xf32>
    %114 = arith.addf %112, %113 : vector<8x128xf32>
    %c3_i32 = arith.constant 3 : i32
    %c8_i32_32 = arith.constant 8 : i32
    %115 = arith.muli %c3_i32, %c8_i32_32 : i32
    %116 = tpu.assume_multiple %115, 8 : i32
    %117 = arith.index_cast %116 : i32 to index
    %c0_33 = arith.constant 0 : index
    %118 = vector.load %arg10[%117, %c0_33] : memref<64x384xf32, #tpu.memory_space<vmem>>, vector<8x384xf32>
    %119 = arith.truncf %114 : vector<8x128xf32> to vector<8x128xbf16>
    %cst_34 = arith.constant dense<0.000000e+00> : vector<8x384xf32>
    %120 = tpu.matmul %119, %10, %cst_34 {dimension_numbers = #tpu.dot_dimension_numbers<[1], [0], [0], [1], [0, 0, 1, 1], [], []>} : vector<8x128xbf16>, vector<128x384xbf16>, vector<8x384xf32> -> vector<8x384xf32>
    %121 = vector.broadcast %11 : vector<1x384xf32> to vector<8x384xf32>
    %122 = arith.addf %120, %121 : vector<8x384xf32>
    %123 = vector.extract_strided_slice %118 {offsets = [0, 0], sizes = [8, 128], strides = [1, 1]} : vector<8x384xf32> to vector<8x128xf32>
    %124 = vector.extract_strided_slice %122 {offsets = [0, 0], sizes = [8, 128], strides = [1, 1]} : vector<8x384xf32> to vector<8x128xf32>
    %125 = arith.addf %123, %124 : vector<8x128xf32>
    %126 = arith.negf %125 : vector<8x128xf32>
    %127 = math.exp %126 : vector<8x128xf32>
    %cst_35 = arith.constant 1.000000e+00 : f32
    %128 = vector.broadcast %cst_35 : f32 to vector<8x128xf32>
    %129 = arith.addf %128, %127 : vector<8x128xf32>
    %130 = arith.divf %128, %129 : vector<8x128xf32>
    %131 = vector.extract_strided_slice %118 {offsets = [0, 128], sizes = [8, 128], strides = [1, 1]} : vector<8x384xf32> to vector<8x128xf32>
    %132 = vector.extract_strided_slice %122 {offsets = [0, 128], sizes = [8, 128], strides = [1, 1]} : vector<8x384xf32> to vector<8x128xf32>
    %133 = arith.addf %131, %132 : vector<8x128xf32>
    %134 = arith.negf %133 : vector<8x128xf32>
    %135 = math.exp %134 : vector<8x128xf32>
    %cst_36 = arith.constant 1.000000e+00 : f32
    %136 = vector.broadcast %cst_36 : f32 to vector<8x128xf32>
    %137 = arith.addf %136, %135 : vector<8x128xf32>
    %138 = arith.divf %136, %137 : vector<8x128xf32>
    %139 = vector.extract_strided_slice %118 {offsets = [0, 256], sizes = [8, 128], strides = [1, 1]} : vector<8x384xf32> to vector<8x128xf32>
    %140 = vector.extract_strided_slice %122 {offsets = [0, 256], sizes = [8, 128], strides = [1, 1]} : vector<8x384xf32> to vector<8x128xf32>
    %141 = arith.mulf %130, %140 : vector<8x128xf32>
    %142 = arith.addf %139, %141 : vector<8x128xf32>
    %143 = math.tanh %142 : vector<8x128xf32>
    %cst_37 = arith.constant 1.000000e+00 : f32
    %144 = vector.broadcast %cst_37 : f32 to vector<8x128xf32>
    %145 = arith.subf %144, %138 : vector<8x128xf32>
    %146 = arith.mulf %145, %143 : vector<8x128xf32>
    %147 = arith.mulf %138, %114 : vector<8x128xf32>
    %148 = arith.addf %146, %147 : vector<8x128xf32>
    %c4_i32 = arith.constant 4 : i32
    %c8_i32_38 = arith.constant 8 : i32
    %149 = arith.muli %c4_i32, %c8_i32_38 : i32
    %150 = tpu.assume_multiple %149, 8 : i32
    %151 = arith.index_cast %150 : i32 to index
    %c0_39 = arith.constant 0 : index
    %152 = vector.load %arg10[%151, %c0_39] : memref<64x384xf32, #tpu.memory_space<vmem>>, vector<8x384xf32>
    %153 = arith.truncf %148 : vector<8x128xf32> to vector<8x128xbf16>
    %cst_40 = arith.constant dense<0.000000e+00> : vector<8x384xf32>
    %154 = tpu.matmul %153, %10, %cst_40 {dimension_numbers = #tpu.dot_dimension_numbers<[1], [0], [0], [1], [0, 0, 1, 1], [], []>} : vector<8x128xbf16>, vector<128x384xbf16>, vector<8x384xf32> -> vector<8x384xf32>
    %155 = vector.broadcast %11 : vector<1x384xf32> to vector<8x384xf32>
    %156 = arith.addf %154, %155 : vector<8x384xf32>
    %157 = vector.extract_strided_slice %152 {offsets = [0, 0], sizes = [8, 128], strides = [1, 1]} : vector<8x384xf32> to vector<8x128xf32>
    %158 = vector.extract_strided_slice %156 {offsets = [0, 0], sizes = [8, 128], strides = [1, 1]} : vector<8x384xf32> to vector<8x128xf32>
    %159 = arith.addf %157, %158 : vector<8x128xf32>
    %160 = arith.negf %159 : vector<8x128xf32>
    %161 = math.exp %160 : vector<8x128xf32>
    %cst_41 = arith.constant 1.000000e+00 : f32
    %162 = vector.broadcast %cst_41 : f32 to vector<8x128xf32>
    %163 = arith.addf %162, %161 : vector<8x128xf32>
    %164 = arith.divf %162, %163 : vector<8x128xf32>
    %165 = vector.extract_strided_slice %152 {offsets = [0, 128], sizes = [8, 128], strides = [1, 1]} : vector<8x384xf32> to vector<8x128xf32>
    %166 = vector.extract_strided_slice %156 {offsets = [0, 128], sizes = [8, 128], strides = [1, 1]} : vector<8x384xf32> to vector<8x128xf32>
    %167 = arith.addf %165, %166 : vector<8x128xf32>
    %168 = arith.negf %167 : vector<8x128xf32>
    %169 = math.exp %168 : vector<8x128xf32>
    %cst_42 = arith.constant 1.000000e+00 : f32
    %170 = vector.broadcast %cst_42 : f32 to vector<8x128xf32>
    %171 = arith.addf %170, %169 : vector<8x128xf32>
    %172 = arith.divf %170, %171 : vector<8x128xf32>
    %173 = vector.extract_strided_slice %152 {offsets = [0, 256], sizes = [8, 128], strides = [1, 1]} : vector<8x384xf32> to vector<8x128xf32>
    %174 = vector.extract_strided_slice %156 {offsets = [0, 256], sizes = [8, 128], strides = [1, 1]} : vector<8x384xf32> to vector<8x128xf32>
    %175 = arith.mulf %164, %174 : vector<8x128xf32>
    %176 = arith.addf %173, %175 : vector<8x128xf32>
    %177 = math.tanh %176 : vector<8x128xf32>
    %cst_43 = arith.constant 1.000000e+00 : f32
    %178 = vector.broadcast %cst_43 : f32 to vector<8x128xf32>
    %179 = arith.subf %178, %172 : vector<8x128xf32>
    %180 = arith.mulf %179, %177 : vector<8x128xf32>
    %181 = arith.mulf %172, %148 : vector<8x128xf32>
    %182 = arith.addf %180, %181 : vector<8x128xf32>
    %c5_i32 = arith.constant 5 : i32
    %c8_i32_44 = arith.constant 8 : i32
    %183 = arith.muli %c5_i32, %c8_i32_44 : i32
    %184 = tpu.assume_multiple %183, 8 : i32
    %185 = arith.index_cast %184 : i32 to index
    %c0_45 = arith.constant 0 : index
    %186 = vector.load %arg10[%185, %c0_45] : memref<64x384xf32, #tpu.memory_space<vmem>>, vector<8x384xf32>
    %187 = arith.truncf %182 : vector<8x128xf32> to vector<8x128xbf16>
    %cst_46 = arith.constant dense<0.000000e+00> : vector<8x384xf32>
    %188 = tpu.matmul %187, %10, %cst_46 {dimension_numbers = #tpu.dot_dimension_numbers<[1], [0], [0], [1], [0, 0, 1, 1], [], []>} : vector<8x128xbf16>, vector<128x384xbf16>, vector<8x384xf32> -> vector<8x384xf32>
    %189 = vector.broadcast %11 : vector<1x384xf32> to vector<8x384xf32>
    %190 = arith.addf %188, %189 : vector<8x384xf32>
    %191 = vector.extract_strided_slice %186 {offsets = [0, 0], sizes = [8, 128], strides = [1, 1]} : vector<8x384xf32> to vector<8x128xf32>
    %192 = vector.extract_strided_slice %190 {offsets = [0, 0], sizes = [8, 128], strides = [1, 1]} : vector<8x384xf32> to vector<8x128xf32>
    %193 = arith.addf %191, %192 : vector<8x128xf32>
    %194 = arith.negf %193 : vector<8x128xf32>
    %195 = math.exp %194 : vector<8x128xf32>
    %cst_47 = arith.constant 1.000000e+00 : f32
    %196 = vector.broadcast %cst_47 : f32 to vector<8x128xf32>
    %197 = arith.addf %196, %195 : vector<8x128xf32>
    %198 = arith.divf %196, %197 : vector<8x128xf32>
    %199 = vector.extract_strided_slice %186 {offsets = [0, 128], sizes = [8, 128], strides = [1, 1]} : vector<8x384xf32> to vector<8x128xf32>
    %200 = vector.extract_strided_slice %190 {offsets = [0, 128], sizes = [8, 128], strides = [1, 1]} : vector<8x384xf32> to vector<8x128xf32>
    %201 = arith.addf %199, %200 : vector<8x128xf32>
    %202 = arith.negf %201 : vector<8x128xf32>
    %203 = math.exp %202 : vector<8x128xf32>
    %cst_48 = arith.constant 1.000000e+00 : f32
    %204 = vector.broadcast %cst_48 : f32 to vector<8x128xf32>
    %205 = arith.addf %204, %203 : vector<8x128xf32>
    %206 = arith.divf %204, %205 : vector<8x128xf32>
    %207 = vector.extract_strided_slice %186 {offsets = [0, 256], sizes = [8, 128], strides = [1, 1]} : vector<8x384xf32> to vector<8x128xf32>
    %208 = vector.extract_strided_slice %190 {offsets = [0, 256], sizes = [8, 128], strides = [1, 1]} : vector<8x384xf32> to vector<8x128xf32>
    %209 = arith.mulf %198, %208 : vector<8x128xf32>
    %210 = arith.addf %207, %209 : vector<8x128xf32>
    %211 = math.tanh %210 : vector<8x128xf32>
    %cst_49 = arith.constant 1.000000e+00 : f32
    %212 = vector.broadcast %cst_49 : f32 to vector<8x128xf32>
    %213 = arith.subf %212, %206 : vector<8x128xf32>
    %214 = arith.mulf %213, %211 : vector<8x128xf32>
    %215 = arith.mulf %206, %182 : vector<8x128xf32>
    %216 = arith.addf %214, %215 : vector<8x128xf32>
    %c6_i32 = arith.constant 6 : i32
    %c8_i32_50 = arith.constant 8 : i32
    %217 = arith.muli %c6_i32, %c8_i32_50 : i32
    %218 = tpu.assume_multiple %217, 8 : i32
    %219 = arith.index_cast %218 : i32 to index
    %c0_51 = arith.constant 0 : index
    %220 = vector.load %arg10[%219, %c0_51] : memref<64x384xf32, #tpu.memory_space<vmem>>, vector<8x384xf32>
    %221 = arith.truncf %216 : vector<8x128xf32> to vector<8x128xbf16>
    %cst_52 = arith.constant dense<0.000000e+00> : vector<8x384xf32>
    %222 = tpu.matmul %221, %10, %cst_52 {dimension_numbers = #tpu.dot_dimension_numbers<[1], [0], [0], [1], [0, 0, 1, 1], [], []>} : vector<8x128xbf16>, vector<128x384xbf16>, vector<8x384xf32> -> vector<8x384xf32>
    %223 = vector.broadcast %11 : vector<1x384xf32> to vector<8x384xf32>
    %224 = arith.addf %222, %223 : vector<8x384xf32>
    %225 = vector.extract_strided_slice %220 {offsets = [0, 0], sizes = [8, 128], strides = [1, 1]} : vector<8x384xf32> to vector<8x128xf32>
    %226 = vector.extract_strided_slice %224 {offsets = [0, 0], sizes = [8, 128], strides = [1, 1]} : vector<8x384xf32> to vector<8x128xf32>
    %227 = arith.addf %225, %226 : vector<8x128xf32>
    %228 = arith.negf %227 : vector<8x128xf32>
    %229 = math.exp %228 : vector<8x128xf32>
    %cst_53 = arith.constant 1.000000e+00 : f32
    %230 = vector.broadcast %cst_53 : f32 to vector<8x128xf32>
    %231 = arith.addf %230, %229 : vector<8x128xf32>
    %232 = arith.divf %230, %231 : vector<8x128xf32>
    %233 = vector.extract_strided_slice %220 {offsets = [0, 128], sizes = [8, 128], strides = [1, 1]} : vector<8x384xf32> to vector<8x128xf32>
    %234 = vector.extract_strided_slice %224 {offsets = [0, 128], sizes = [8, 128], strides = [1, 1]} : vector<8x384xf32> to vector<8x128xf32>
    %235 = arith.addf %233, %234 : vector<8x128xf32>
    %236 = arith.negf %235 : vector<8x128xf32>
    %237 = math.exp %236 : vector<8x128xf32>
    %cst_54 = arith.constant 1.000000e+00 : f32
    %238 = vector.broadcast %cst_54 : f32 to vector<8x128xf32>
    %239 = arith.addf %238, %237 : vector<8x128xf32>
    %240 = arith.divf %238, %239 : vector<8x128xf32>
    %241 = vector.extract_strided_slice %220 {offsets = [0, 256], sizes = [8, 128], strides = [1, 1]} : vector<8x384xf32> to vector<8x128xf32>
    %242 = vector.extract_strided_slice %224 {offsets = [0, 256], sizes = [8, 128], strides = [1, 1]} : vector<8x384xf32> to vector<8x128xf32>
    %243 = arith.mulf %232, %242 : vector<8x128xf32>
    %244 = arith.addf %241, %243 : vector<8x128xf32>
    %245 = math.tanh %244 : vector<8x128xf32>
    %cst_55 = arith.constant 1.000000e+00 : f32
    %246 = vector.broadcast %cst_55 : f32 to vector<8x128xf32>
    %247 = arith.subf %246, %240 : vector<8x128xf32>
    %248 = arith.mulf %247, %245 : vector<8x128xf32>
    %249 = arith.mulf %240, %216 : vector<8x128xf32>
    %250 = arith.addf %248, %249 : vector<8x128xf32>
    %c7_i32 = arith.constant 7 : i32
    %c8_i32_56 = arith.constant 8 : i32
    %251 = arith.muli %c7_i32, %c8_i32_56 : i32
    %252 = tpu.assume_multiple %251, 8 : i32
    %253 = arith.index_cast %252 : i32 to index
    %c0_57 = arith.constant 0 : index
    %254 = vector.load %arg10[%253, %c0_57] : memref<64x384xf32, #tpu.memory_space<vmem>>, vector<8x384xf32>
    %255 = arith.truncf %250 : vector<8x128xf32> to vector<8x128xbf16>
    %cst_58 = arith.constant dense<0.000000e+00> : vector<8x384xf32>
    %256 = tpu.matmul %255, %10, %cst_58 {dimension_numbers = #tpu.dot_dimension_numbers<[1], [0], [0], [1], [0, 0, 1, 1], [], []>} : vector<8x128xbf16>, vector<128x384xbf16>, vector<8x384xf32> -> vector<8x384xf32>
    %257 = vector.broadcast %11 : vector<1x384xf32> to vector<8x384xf32>
    %258 = arith.addf %256, %257 : vector<8x384xf32>
    %259 = vector.extract_strided_slice %254 {offsets = [0, 0], sizes = [8, 128], strides = [1, 1]} : vector<8x384xf32> to vector<8x128xf32>
    %260 = vector.extract_strided_slice %258 {offsets = [0, 0], sizes = [8, 128], strides = [1, 1]} : vector<8x384xf32> to vector<8x128xf32>
    %261 = arith.addf %259, %260 : vector<8x128xf32>
    %262 = arith.negf %261 : vector<8x128xf32>
    %263 = math.exp %262 : vector<8x128xf32>
    %cst_59 = arith.constant 1.000000e+00 : f32
    %264 = vector.broadcast %cst_59 : f32 to vector<8x128xf32>
    %265 = arith.addf %264, %263 : vector<8x128xf32>
    %266 = arith.divf %264, %265 : vector<8x128xf32>
    %267 = vector.extract_strided_slice %254 {offsets = [0, 128], sizes = [8, 128], strides = [1, 1]} : vector<8x384xf32> to vector<8x128xf32>
    %268 = vector.extract_strided_slice %258 {offsets = [0, 128], sizes = [8, 128], strides = [1, 1]} : vector<8x384xf32> to vector<8x128xf32>
    %269 = arith.addf %267, %268 : vector<8x128xf32>
    %270 = arith.negf %269 : vector<8x128xf32>
    %271 = math.exp %270 : vector<8x128xf32>
    %cst_60 = arith.constant 1.000000e+00 : f32
    %272 = vector.broadcast %cst_60 : f32 to vector<8x128xf32>
    %273 = arith.addf %272, %271 : vector<8x128xf32>
    %274 = arith.divf %272, %273 : vector<8x128xf32>
    %275 = vector.extract_strided_slice %254 {offsets = [0, 256], sizes = [8, 128], strides = [1, 1]} : vector<8x384xf32> to vector<8x128xf32>
    %276 = vector.extract_strided_slice %258 {offsets = [0, 256], sizes = [8, 128], strides = [1, 1]} : vector<8x384xf32> to vector<8x128xf32>
    %277 = arith.mulf %266, %276 : vector<8x128xf32>
    %278 = arith.addf %275, %277 : vector<8x128xf32>
    %279 = math.tanh %278 : vector<8x128xf32>
    %cst_61 = arith.constant 1.000000e+00 : f32
    %280 = vector.broadcast %cst_61 : f32 to vector<8x128xf32>
    %281 = arith.subf %280, %274 : vector<8x128xf32>
    %282 = arith.mulf %281, %279 : vector<8x128xf32>
    %283 = arith.mulf %274, %250 : vector<8x128xf32>
    %284 = arith.addf %282, %283 : vector<8x128xf32>
    %c8_i32_62 = arith.constant 8 : i32
    %c0_63 = arith.constant 0 : index
    %c0_64 = arith.constant 0 : index
    %285 = vector.load %arg9[%c0_63, %c0_64] : memref<8x128xf32, #tpu.memory_space<vmem>>, vector<8x128xf32>
    tpu.vector_store %arg9[%c0_63, %c0_64], %284 {strides = array<i32>} : memref<8x128xf32, #tpu.memory_space<vmem>>, vector<8x128xf32>,
    %c0_i32_65 = arith.constant 0 : i32
    %286 = arith.cmpi eq, %arg0, %c0_i32_65 : i32
    %287 = arith.extui %286 : i1 to i32
    %c0_i32_66 = arith.constant 0 : i32
    %288 = arith.cmpi ne, %287, %c0_i32_66 : i32
    scf.if %288 {
      %289 = arith.truncf %284 : vector<8x128xf32> to vector<8x128xbf16>
      %c0_67 = arith.constant 0 : index
      %c0_68 = arith.constant 0 : index
      %290 = vector.load %arg6[%c0_67, %c0_68] : memref<128x128xbf16, #tpu.memory_space<vmem>>, vector<128x128xbf16>
      %cst_69 = arith.constant dense<0.000000e+00> : vector<8x128xf32>
      %291 = tpu.matmul %289, %290, %cst_69 {dimension_numbers = #tpu.dot_dimension_numbers<[1], [0], [0], [1], [0, 0, 1, 1], [], []>} : vector<8x128xbf16>, vector<128x128xbf16>, vector<8x128xf32> -> vector<8x128xf32>
      %c0_70 = arith.constant 0 : index
      %c0_71 = arith.constant 0 : index
      %292 = vector.load %arg7[%c0_70, %c0_71] : memref<1x128xf32, #tpu.memory_space<vmem>>, vector<1x128xf32>
      %293 = vector.broadcast %292 : vector<1x128xf32> to vector<8x128xf32>
      %294 = arith.addf %291, %293 : vector<8x128xf32>
      %c0_72 = arith.constant 0 : index
      %c0_73 = arith.constant 0 : index
      %295 = vector.load %arg8[%c0_72, %c0_73] : memref<8x128xf32, #tpu.memory_space<vmem>>, vector<8x128xf32>
      tpu.vector_store %arg8[%c0_72, %c0_73], %294 {strides = array<i32>} : memref<8x128xf32, #tpu.memory_space<vmem>>, vector<8x128xf32>,
    } else {
    }
    return
  }
  func.func @transform_0(%arg0: i32) -> (i32, i32) {
    %c0_i32 = arith.constant 0 : i32
    %c0_i32_0 = arith.constant 0 : i32
    return %arg0, %c0_i32 : i32, i32
  }
  func.func @transform_1(%arg0: i32) -> (i32, i32) {
    %c0_i32 = arith.constant 0 : i32
    %c0_i32_0 = arith.constant 0 : i32
    %c0_i32_1 = arith.constant 0 : i32
    return %c0_i32, %c0_i32_0 : i32, i32
  }
  func.func @transform_2(%arg0: i32) -> (i32, i32) {
    %c0_i32 = arith.constant 0 : i32
    %c0_i32_0 = arith.constant 0 : i32
    %c0_i32_1 = arith.constant 0 : i32
    return %c0_i32, %c0_i32_0 : i32, i32
  }
  func.func @transform_3(%arg0: i32) -> (i32, i32) {
    %c0_i32 = arith.constant 0 : i32
    %c0_i32_0 = arith.constant 0 : i32
    %c0_i32_1 = arith.constant 0 : i32
    return %c0_i32, %c0_i32_0 : i32, i32
  }
  func.func @transform_4(%arg0: i32) -> (i32, i32) {
    %c0_i32 = arith.constant 0 : i32
    %c0_i32_0 = arith.constant 0 : i32
    %c0_i32_1 = arith.constant 0 : i32
    return %c0_i32, %c0_i32_0 : i32, i32
  }
  func.func @transform_5(%arg0: i32) -> (i32, i32) {
    %c0_i32 = arith.constant 0 : i32
    %c0_i32_0 = arith.constant 0 : i32
    %c0_i32_1 = arith.constant 0 : i32
    return %c0_i32, %c0_i32_0 : i32, i32
  }
  func.func @transform_6(%arg0: i32) -> (i32, i32) {
    %c0_i32 = arith.constant 0 : i32
    %c0_i32_0 = arith.constant 0 : i32
    %c0_i32_1 = arith.constant 0 : i32
    return %c0_i32, %c0_i32_0 : i32, i32
  }
  func.func @transform_7(%arg0: i32) -> (i32, i32) {
    %c0_i32 = arith.constant 0 : i32
    %c0_i32_0 = arith.constant 0 : i32
    %c0_i32_1 = arith.constant 0 : i32
    return %c0_i32, %c0_i32_0 : i32, i32
  }
}

</mosaic_0001>

<bundles_post_ra>
// kernel: student_forward.1
= control target key start
LH: loop header
LB: loop body
LE: loop exit
PB: predicated region body
PF: predicated region fallthrough
CT: control target
= control target key end

     0   :  { %12 = vsyncpa [#allocation5], 0  ;;  %s1797_s27 = smov [#allocation4]   ;;  %s1798_s29 = smov 192   ;;  %s2424_s0 = inlined_call_operand.vmem [shape: bf16[64,128], index: 0, kind: input, shape index: {}]   ;;  %s2425_s1 = inlined_call_operand.vmem [shape: bf16[128,384], index: 1, kind: input, shape index: {}]   ;;  %s2426_s2 = inlined_call_operand.hbm [shape: bf16[128,384], index: 2, kind: input, shape index: {}]   ;;  %s2427_s3 = inlined_call_operand.vmem [shape: f32[1,384], index: 3, kind: input, shape index: {}]   ;;  %s2428_s4 = inlined_call_operand.vmem [shape: f32[1,384], index: 4, kind: input, shape index: {}]   ;;  %s2429_s5 = inlined_call_operand.vmem [shape: bf16[128,128], index: 5, kind: input, shape index: {}]   ;;  %s2430_s6 = inlined_call_operand.vmem [shape: f32[1,128], index: 6, kind: input, shape index: {}]   ;;  %s2431_s7 = inlined_call_operand.vmem [shape: f32[8,128], index: 7, kind: output, shape index: {}]  }
   0x1   :  { %s21_s26 = sshll.u32 %s2426_s2, 4  ;;  %s23_s28 = sshll.u32 %s1797_s27, 4  ;;  %s22_s26 = int_to_ptr.hbm [resolvable:$true] %s21_s26  ;;  %s24_s28 = int_to_ptr.vmem [resolvable:$true] %s23_s28 }
   0x2   :  { %s1799_s30 = smov 12  }
   0x3   :  { %29 = dma.hbm_to_vmem [thread:$0]  %s22_s26, 3072, %s24_s28, [#allocation5], %s1798_s29, %s1798_s29, %s1799_s30  }
   0x4   :  { %1795 = dma.done.wait [#allocation5], 3072  }
   0x5   :  { %1796 = vsyncadd [#allocation5], 4294964224  ;;  %v1472_v0 = vld [vmem:[%s2425_s1 + $0xa8] sm:$0xf]  ;;  %v1652_v1 = vld [vmem:[%s2425_s1 + $0xb0] sm:$0xf0] }
   0x6   :  { %v1568_v2 = vld [vmem:[#allocation4 + $0xa8] sm:$0xf]  ;;  %v1473_v3 = vor.u32 %v1652_v1, %v1472_v0  ;;  %v1676_v4 = vld [vmem:[#allocation4 + $0xb0] sm:$0xf0]  ;;  %v1460_v5 = vld [vmem:[%s2425_s1 + $0x90] sm:$0xf] }
   0x7   :  { %v1649_v6 = vld [vmem:[%s2425_s1 + $0x98] sm:$0xf0]  ;;  %v1856_v7 = vor.u32 %v1676_v4, %v1568_v2  ;;  %v1556_v8 = vld [vmem:[#allocation4 + $0x90] sm:$0xf]  ;;  %v1448_v12 = vld [vmem:[%s2425_s1 + $0x78] sm:$0xf] }
   0x8   :  { %v1673_v9 = vld [vmem:[#allocation4 + $0x98] sm:$0xf0]  ;;  %247 = vmatpush.bf16.msra.mxu0 %v1473_v3  ;;  %v1461_v10 = vor.u32 %v1649_v6, %v1460_v5  ;;  %v1646_v13 = vld [vmem:[%s2425_s1 + $0x80] sm:$0xf0]  ;;  %v1544_v14 = vld [vmem:[#allocation4 + $0x78] sm:$0xf] }
   0x9   :  { %534 = vmatpush.bf16.msra.mxu3 %v1856_v7  ;;  %v1859_v11 = vor.u32 %v1673_v9, %v1556_v8  ;;  %v1670_v15 = vld [vmem:[#allocation4 + $0x80] sm:$0xf0]  ;;  %v1449_v16 = vor.u32 %v1646_v13, %v1448_v12  ;;  %v1436_v18 = vld [vmem:[%s2425_s1 + $0x60] sm:$0xf]  ;;  %v1643_v19 = vld [vmem:[%s2425_s1 + $0x68] sm:$0xf0] }
   0xa   :  { %v1868_v17 = vor.u32 %v1670_v15, %v1544_v14  ;;  %v1532_v20 = vld [vmem:[#allocation4 + $0x60] sm:$0xf]  ;;  %v1667_v21 = vld [vmem:[#allocation4 + $0x68] sm:$0xf0]  ;;  %v1437_v22 = vor.u32 %v1643_v19, %v1436_v18  ;;  %v1424_v24 = vld [vmem:[%s2425_s1 + $0x48] sm:$0xf] }
   0xb   :  { %v1877_v23 = vor.u32 %v1667_v21, %v1532_v20  ;;  %v1640_v25 = vld [vmem:[%s2425_s1 + $0x50] sm:$0xf0]  ;;  %v1520_v26 = vld [vmem:[#allocation4 + $0x48] sm:$0xf]  ;;  %v1651_v28 = vld [vmem:[%s2425_s1 + $0xac] sm:$0xf] }
   0xc   :  { %248 = vmatpush.bf16.msra.mxu0 %v1461_v10  ;;  %v1664_v27 = vld [vmem:[#allocation4 + $0x50] sm:$0xf0]  ;;  %v1474_v29 = vld [vmem:[%s2425_s1 + $0xb4] sm:$0xf0]  ;;  %v1462_v32 = vld [vmem:[%s2425_s1 + $0x9c] sm:$0xf0]  ;;  %v1425_v33 = vor.u32 %v1640_v25, %v1424_v24 }
   0xd   :  { %535 = vmatpush.bf16.msra.mxu3 %v1859_v11  ;;  %v1477_v30 = vor.u32 %v1651_v28, %v1474_v29  ;;  %v1648_v31 = vld [vmem:[%s2425_s1 + $0x94] sm:$0xf]  ;;  %v1898_v34 = vor.u32 %v1664_v27, %v1520_v26  ;;  %v1412_v35 = vld [vmem:[%s2425_s1 + $0x30] sm:$0xf]  ;;  %v1637_v36 = vld [vmem:[%s2425_s1 + $0x38] sm:$0xf0] }
   0xe   :  { %v1508_v37 = vld [vmem:[#allocation4 + $0x30] sm:$0xf]  ;;  %v1465_v38 = vor.u32 %v1648_v31, %v1462_v32  ;;  %v1661_v39 = vld [vmem:[#allocation4 + $0x38] sm:$0xf0]  ;;  %v1450_v41 = vld [vmem:[%s2425_s1 + $0x84] sm:$0xf0]  ;;  %v1413_v42 = vor.u32 %v1637_v36, %v1412_v35 }
   0xf   :  { %276 = vmatpush.bf16.msra.mxu1 %v1477_v30  ;;  %v1645_v40 = vld [vmem:[%s2425_s1 + $0x7c] sm:$0xf]  ;;  %v1400_v43 = vld [vmem:[%s2425_s1 + $0x18] sm:$0xf]  ;;  %v1634_v44 = vld [vmem:[%s2425_s1 + $0x20] sm:$0xf0]  ;;  %v1919_v46 = vor.u32 %v1661_v39, %v1508_v37 }
  0x10   :  { %249 = vmatpush.bf16.msra.mxu0 %v1449_v16  ;;  %v1496_v45 = vld [vmem:[#allocation4 + $0x18] sm:$0xf]  ;;  %v1658_v47 = vld [vmem:[#allocation4 + $0x20] sm:$0xf0]  ;;  %v1453_v48 = vor.u32 %v1645_v40, %v1450_v41  ;;  %v1438_v50 = vld [vmem:[%s2425_s1 + $0x6c] sm:$0xf0]  ;;  %v1401_v54 = vor.u32 %v1634_v44, %v1400_v43 }
  0x11   :  { %536 = vmatpush.bf16.msra.mxu3 %v1868_v17  ;;  %v1642_v49 = vld [vmem:[%s2425_s1 + $0x64] sm:$0xf]  ;;  %v1480_v51 = vld [vmem:[%s2425_s1 + $0xb0] sm:$0xf]  ;;  %v1653_v52 = vld [vmem:[%s2425_s1 + $0xb8] sm:$0xf0]  ;;  %v1940_v58 = vor.u32 %v1658_v47, %v1496_v45 }
  0x12   :  { %v1481_v53 = vor.u32 %v1653_v52, %v1480_v51  ;;  %v1388_v55 = vld [vmem:[%s2425_s1] sm:$0xf]  ;;  %v1631_v56 = vld [vmem:[%s2425_s1 + $0x8] sm:$0xf0]  ;;  %v1570_v61 = vld [vmem:[#allocation4 + $0xb4] sm:$0xf0]  ;;  %v1441_v62 = vor.u32 %v1642_v49, %v1438_v50 }
  0x13   :  { %277 = vmatpush.bf16.msra.mxu1 %v1465_v38  ;;  %v1484_v57 = vld [vmem:[#allocation4] sm:$0xf]  ;;  %v1655_v59 = vld [vmem:[#allocation4 + $0x8] sm:$0xf0]  ;;  %v1576_v63 = vld [vmem:[#allocation4 + $0xb0] sm:$0xf]  ;;  %v1389_v5 = vor.u32 %v1631_v56, %v1388_v55 }
  0x14   :  { %250 = vmatpush.bf16.msra.mxu0 %v1437_v22  ;;  %v1675_v60 = vld [vmem:[#allocation4 + $0xac] sm:$0xf]  ;;  %v1677_v0 = vld [vmem:[#allocation4 + $0xb8] sm:$0xf0]  ;;  %305 = vmatpush.bf16.msra.mxu2 %v1481_v53  ;;  %v1468_v1 = vld [vmem:[%s2425_s1 + $0x98] sm:$0xf]  ;;  %v1955_v8 = vor.u32 %v1655_v59, %v1484_v57 }
  0x15   :  { %537 = vmatpush.bf16.msra.mxu3 %v1877_v23  ;;  %v1639_v2 = vld [vmem:[%s2425_s1 + $0x4c] sm:$0xf]  ;;  %v1426_v3 = vld [vmem:[%s2425_s1 + $0x54] sm:$0xf0]  ;;  %v1650_v4 = vld [vmem:[%s2425_s1 + $0xa0] sm:$0xf0]  ;;  %v1962_v10 = vor.u32 %v1677_v0, %v1576_v63  ;;  %v1964_v14 = vor.u32 %v1675_v60, %v1570_v61 }
  0x16   :  { %v1469_v6 = vor.u32 %v1650_v4, %v1468_v1  ;;  %v1960_v9 = vld [vmem:[%s2424_s0] sm:$0xff]  ;;  %v1672_v12 = vld [vmem:[#allocation4 + $0x94] sm:$0xf]  ;;  %v1564_v13 = vld [vmem:[#allocation4 + $0x98] sm:$0xf]  ;;  %v1429_v16 = vor.u32 %v1639_v2, %v1426_v3  ;;  %v1800_v38 = vmov 0.0|0.0  }
  0x17   :  { %278 = vmatpush.bf16.msra.mxu1 %v1453_v48  ;;  %v1674_v15 = vld [vmem:[#allocation4 + $0xa0] sm:$0xf0]  ;;  %v1456_v18 = vld [vmem:[%s2425_s1 + $0x80] sm:$0xf]  ;;  %v1647_v19 = vld [vmem:[%s2425_s1 + $0x88] sm:$0xf0] }
  0x18   :  { %251 = vmatpush.bf16.msra.mxu0 %v1425_v33  ;;  %306 = vmatpush.bf16.msra.mxu2 %v1469_v6  ;;  %v1558_v20 = vld [vmem:[#allocation4 + $0x9c] sm:$0xf0]  ;;  %v1636_v21 = vld [vmem:[%s2425_s1 + $0x34] sm:$0xf]  ;;  %v1457_v24 = vor.u32 %v1647_v19, %v1456_v18  ;;  %v1669_v25 = vld [vmem:[#allocation4 + $0x7c] sm:$0xf]  ;;  %v1980_v26 = vor.u32 %v1674_v15, %v1564_v13 }
  0x19   :  { %538 = vmatpush.bf16.msra.mxu3 %v1898_v34  ;;  %v1414_v22 = vld [vmem:[%s2425_s1 + $0x3c] sm:$0xf0]  ;;  %v1983_v28 = vor.u32 %v1672_v12, %v1558_v20  ;;  %v1671_v29 = vld [vmem:[#allocation4 + $0x88] sm:$0xf0]  ;;  %v1444_v31 = vld [vmem:[%s2425_s1 + $0x68] sm:$0xf] }
  0x1a   :  { %v1552_v27 = vld [vmem:[#allocation4 + $0x80] sm:$0xf]  ;;  %v1417_v30 = vor.u32 %v1636_v21, %v1414_v22  ;;  %v1644_v32 = vld [vmem:[%s2425_s1 + $0x70] sm:$0xf0]  ;;  %v1546_v33 = vld [vmem:[#allocation4 + $0x84] sm:$0xf0] }
  0x1b   :  { %279 = vmatpush.bf16.msra.mxu1 %v1441_v62  ;;  %v1633_v35 = vld [vmem:[%s2425_s1 + $0x1c] sm:$0xf]  ;;  %v1402_v36 = vld [vmem:[%s2425_s1 + $0x24] sm:$0xf0]  ;;  %v1445_v37 = vor.u32 %v1644_v32, %v1444_v31  ;;  %v1432_v39 = vld [vmem:[%s2425_s1 + $0x50] sm:$0xf]  ;;  %v2006_v41 = vor.u32 %v1671_v29, %v1552_v27 }
  0x1c   :  { %252 = vmatpush.bf16.msra.mxu0 %v1413_v42  ;;  %307 = vmatpush.bf16.msra.mxu2 %v1457_v24  ;;  %v1641_v40 = vld [vmem:[%s2425_s1 + $0x58] sm:$0xf0]  ;;  %v2009_v42 = vor.u32 %v1669_v25, %v1546_v33  ;;  %v1666_v43 = vld [vmem:[#allocation4 + $0x64] sm:$0xf]  ;;  %v1540_v44 = vld [vmem:[#allocation4 + $0x68] sm:$0xf]  ;;  %v1405_v47 = vor.u32 %v1633_v35, %v1402_v36 }
  0x1d   :  { %539 = vmatpush.bf16.msra.mxu3 %v1919_v46  ;;  %v1668_v45 = vld [vmem:[#allocation4 + $0x70] sm:$0xf0]  ;;  %v1534_v48 = vld [vmem:[#allocation4 + $0x6c] sm:$0xf0]  ;;  %v1630_v49 = vld [vmem:[%s2425_s1 + $0x4] sm:$0xf]  ;;  %v1433_v51 = vor.u32 %v1641_v40, %v1432_v39 }
  0x1e   :  { %v1390_v50 = vld [vmem:[%s2425_s1 + $0xc] sm:$0xf0]  ;;  %v1420_v52 = vld [vmem:[%s2425_s1 + $0x38] sm:$0xf]  ;;  %v1638_v53 = vld [vmem:[%s2425_s1 + $0x40] sm:$0xf0]  ;;  %v2027_v55 = vor.u32 %v1666_v43, %v1534_v48 }
  0x1f   :  { %280 = vmatpush.bf16.msra.mxu1 %v1429_v16  ;;  %v1393_v56 = vor.u32 %v1630_v49, %v1390_v50  ;;  %v1528_v57 = vld [vmem:[#allocation4 + $0x50] sm:$0xf]  ;;  %v1665_v59 = vld [vmem:[#allocation4 + $0x58] sm:$0xf0]  ;;  %v1663_v60 = vld [vmem:[#allocation4 + $0x4c] sm:$0xf]  ;;  %v1421_v62 = vor.u32 %v1638_v53, %v1420_v52 }
  0x20   :  { %253 = vmatpush.bf16.msra.mxu0 %v1401_v54  ;;  %308 = vmatpush.bf16.msra.mxu2 %v1445_v37  ;;  %v2024_v54 = vor.u32 %v1668_v45, %v1540_v44  ;;  %v1522_v61 = vld [vmem:[#allocation4 + $0x54] sm:$0xf0]  ;;  %v1408_v63 = vld [vmem:[%s2425_s1 + $0x20] sm:$0xf]  ;;  %v1635_v0 = vld [vmem:[%s2425_s1 + $0x28] sm:$0xf0]  ;;  %v2036_v1 = vor.u32 %v1665_v59, %v1528_v57 }
  0x21   :  { %540 = vmatpush.bf16.msra.mxu3 %v1940_v58  ;;  %v2039_v2 = vor.u32 %v1663_v60, %v1522_v61  ;;  %v1516_v3 = vld [vmem:[#allocation4 + $0x38] sm:$0xf]  ;;  %v1662_v4 = vld [vmem:[#allocation4 + $0x40] sm:$0xf0]  ;;  %v1660_v6 = vld [vmem:[#allocation4 + $0x34] sm:$0xf]  ;;  %v1409_v13 = vor.u32 %v1635_v0, %v1408_v63 }
  0x22   :  { %v1510_v12 = vld [vmem:[#allocation4 + $0x3c] sm:$0xf0]  ;;  %v2047_v15 = vor.u32 %v1662_v4, %v1516_v3  ;;  %v1657_v18 = vld [vmem:[#allocation4 + $0x1c] sm:$0xf]  ;;  %v1396_v19 = vld [vmem:[%s2425_s1 + $0x8] sm:$0xf] }
  0x23   :  { %281 = vmatpush.bf16.msra.mxu1 %v1417_v30  ;;  %v2050_v16 = vor.u32 %v1660_v6, %v1510_v12  ;;  %v1632_v20 = vld [vmem:[%s2425_s1 + $0x10] sm:$0xf0]  ;;  %v1498_v21 = vld [vmem:[#allocation4 + $0x24] sm:$0xf0]  ;;  %v1504_v22 = vld [vmem:[#allocation4 + $0x20] sm:$0xf] }
  0x24   :  { %254 = vmatpush.bf16.msra.mxu0 %v1389_v5  ;;  %309 = vmatpush.bf16.msra.mxu2 %v1433_v51  ;;  %v1627_v5 = vld [vmem:[%s2424_s0 + $0x8] sm:$0xff]  ;;  %v1397_v25 = vor.u32 %v1632_v20, %v1396_v19  ;;  %v2063_v29 = vor.u32 %v1657_v18, %v1498_v21  ;;  %v1656_v31 = vld [vmem:[#allocation4 + $0x10] sm:$0xf0]  ;;  %v1654_v32 = vld [vmem:[#allocation4 + $0x4] sm:$0xf] }
  0x25   :  { %541 = vmatpush.bf16.msra.mxu3 %v1955_v8  ;;  %v1659_v24 = vld [vmem:[#allocation4 + $0x28] sm:$0xf0]  ;;  %v1492_v30 = vld [vmem:[#allocation4 + $0x8] sm:$0xf]  ;;  %v1486_v33 = vld [vmem:[#allocation4 + $0xc] sm:$0xf0] }
  0x26   :  { %v2060_v27 = vor.u32 %v1659_v24, %v1504_v22  ;;  %v2068_v35 = vor.u32 %v1656_v31, %v1492_v30  ;;  %v2071_v36 = vor.u32 %v1654_v32, %v1486_v33  ;;  %v1628_v37 = vld [vmem:[%s2424_s0 + $0x10] sm:$0xff]  ;;  %v87_v39 = vld [vmem:[%s2427_s3] sm:$0x7] }
  0x27   :  { %255 = vmatmul.bf16.vlgmr.msra.gmra.mxu0 %v1960_v9  ;;  %282 = vmatpush.bf16.msra.mxu1 %v1405_v47  ;;  %v390_v40 = vld [vmem:[%s2428_s4] sm:$0x7]  ;;  %v89_v43 = vperm.slane %v87_v39, 0  ;;  %v2159_v63 = vperm.slane %v87_v39, 1  ;;  %v2165_v12 = vperm.slane %v87_v39, 2 }
  0x28   :  { %560 = vmatpush.bf16.msrb.mxu0 %v1962_v10  ;;  %542 = vmatmul.bf16.vlgmr.msra.gmra.mxu3 %v1800_v38  ;;  %v2150_v47 = vperm.slane %v390_v40, 0 }
  0x29   :  { %547 = vmatpush.bf16.msrb.mxu3 %v1964_v14  ;;  %310 = vmatpush.bf16.msra.mxu2 %v1421_v62  ;;  %2433 = vst [vmem:[#allocation7_spill] sm:$0xff] %v2165_v12 }
  0x2b   :  { %283 = vmatpush.bf16.msra.mxu1 %v1393_v56 }
  0x2c   :  { %561 = vmatpush.bf16.msrb.mxu0 %v1980_v26 }
  0x2d   :  { %548 = vmatpush.bf16.msrb.mxu3 %v1983_v28  ;;  %311 = vmatpush.bf16.msra.mxu2 %v1409_v13 }
  0x2e   :  { %284 = vmatmul.bf16.vlgmr.msra.gmra.mxu1 %v1960_v9 }
  0x2f   :  { %627 = vmatpush.bf16.msrb.mxu1 %v1856_v7 }
  0x30   :  { %562 = vmatpush.bf16.msrb.mxu0 %v2006_v41 }
  0x31   :  { %549 = vmatpush.bf16.msrb.mxu3 %v2009_v42  ;;  %312 = vmatpush.bf16.msra.mxu2 %v1397_v25 }
  0x33   :  { %628 = vmatpush.bf16.msrb.mxu1 %v1859_v11 }
  0x34   :  { %563 = vmatpush.bf16.msrb.mxu0 %v2024_v54  ;;  %313 = vmatmul.bf16.vlgmr.msra.gmra.mxu2 %v1960_v9  ;;  %v1629_v9 = vld [vmem:[%s2424_s0 + $0x18] sm:$0xff] }
  0x35   :  { %550 = vmatpush.bf16.msrb.mxu3 %v2027_v55  ;;  %640 = vmatpush.bf16.msrb.mxu2 %v1964_v14 }
  0x37   :  { %260 = vmatmul.bf16.gmra.mxu0 %v1627_v5  ;;  %629 = vmatpush.bf16.msrb.mxu1 %v1868_v17 }
  0x38   :  { %564 = vmatpush.bf16.msrb.mxu0 %v2036_v1 }
  0x39   :  { %551 = vmatpush.bf16.msrb.mxu3 %v2039_v2  ;;  %641 = vmatpush.bf16.msrb.mxu2 %v1983_v28 }
  0x3b   :  { %630 = vmatpush.bf16.msrb.mxu1 %v1877_v23 }
  0x3c   :  { %565 = vmatpush.bf16.msrb.mxu0 %v2047_v15 }
  0x3d   :  { %552 = vmatpush.bf16.msrb.mxu3 %v2050_v16  ;;  %642 = vmatpush.bf16.msrb.mxu2 %v2009_v42 }
  0x3e   :  { %289 = vmatmul.bf16.gmra.mxu1 %v1627_v5 }
  0x3f   :  { %631 = vmatpush.bf16.msrb.mxu1 %v1898_v34 }
  0x40   :  { %566 = vmatpush.bf16.msrb.mxu0 %v2060_v27 }
  0x41   :  { %553 = vmatpush.bf16.msrb.mxu3 %v2063_v29  ;;  %643 = vmatpush.bf16.msrb.mxu2 %v2027_v55 }
  0x43   :  { %632 = vmatpush.bf16.msrb.mxu1 %v1919_v46 }
  0x44   :  { %567 = vmatpush.bf16.msrb.mxu0 %v2068_v35  ;;  %318 = vmatmul.bf16.gmra.mxu2 %v1627_v5  ;;  %v2163_v5 = vperm.slane %v390_v40, 1 }
  0x45   :  { %554 = vmatpush.bf16.msrb.mxu3 %v2071_v36  ;;  %644 = vmatpush.bf16.msrb.mxu2 %v2039_v2 }
  0x47   :  { %265 = vmatmul.bf16.gmra.mxu0 %v1628_v37  ;;  %633 = vmatpush.bf16.msrb.mxu1 %v1940_v58 }
  0x48   :  { %720 = vmatpush.bf16.msra.mxu0 %v1856_v7  ;;  %555 = vmatmul.bf16.vlgmr.msrb.gmra.mxu3 %v1800_v38 }
  0x49   :  { %653 = vmatpush.bf16.msra.mxu3 %v1962_v10  ;;  %645 = vmatpush.bf16.msrb.mxu2 %v2050_v16 }
  0x4b   :  { %634 = vmatpush.bf16.msrb.mxu1 %v1955_v8 }
  0x4c   :  { %721 = vmatpush.bf16.msra.mxu0 %v1859_v11 }
  0x4d   :  { %654 = vmatpush.bf16.msra.mxu3 %v1980_v26  ;;  %646 = vmatpush.bf16.msrb.mxu2 %v2063_v29 }
  0x4e   :  { %294 = vmatmul.bf16.gmra.mxu1 %v1628_v37 }
  0x4f   :  { %733 = vmatpush.bf16.msra.mxu1 %v1964_v14 }
  0x50   :  { %722 = vmatpush.bf16.msra.mxu0 %v1868_v17 }
  0x51   :  { %655 = vmatpush.bf16.msra.mxu3 %v2006_v41  ;;  %647 = vmatpush.bf16.msrb.mxu2 %v2071_v36 }
  0x53   :  { %734 = vmatpush.bf16.msra.mxu1 %v1983_v28 }
  0x54   :  { %723 = vmatpush.bf16.msra.mxu0 %v1877_v23  ;;  %323 = vmatmul.bf16.gmra.mxu2 %v1628_v37 }
  0x55   :  { %656 = vmatpush.bf16.msra.mxu3 %v2024_v54  ;;  %746 = vmatpush.bf16.msra.mxu2 %v1962_v10 }
  0x57   :  { %270 = vmatmul.bf16.gmra.mxu0 %v1629_v9  ;;  %735 = vmatpush.bf16.msra.mxu1 %v2009_v42 }
  0x58   :  { %724 = vmatpush.bf16.msra.mxu0 %v1898_v34 }
  0x59   :  { %657 = vmatpush.bf16.msra.mxu3 %v2036_v1  ;;  %747 = vmatpush.bf16.msra.mxu2 %v1980_v26 }
  0x5b   :  { %736 = vmatpush.bf16.msra.mxu1 %v2027_v55 }
  0x5c   :  { %725 = vmatpush.bf16.msra.mxu0 %v1919_v46 }
  0x5d   :  { %658 = vmatpush.bf16.msra.mxu3 %v2047_v15  ;;  %748 = vmatpush.bf16.msra.mxu2 %v2006_v41 }
  0x5e   :  { %299 = vmatmul.bf16.gmra.mxu1 %v1629_v9 }
  0x5f   :  { %737 = vmatpush.bf16.msra.mxu1 %v2039_v2 }
  0x60   :  { %726 = vmatpush.bf16.msra.mxu0 %v1940_v58 }
  0x61   :  { %659 = vmatpush.bf16.msra.mxu3 %v2060_v27  ;;  %749 = vmatpush.bf16.msra.mxu2 %v2024_v54 }
  0x63   :  { %738 = vmatpush.bf16.msra.mxu1 %v2050_v16 }
  0x64   :  { %727 = vmatpush.bf16.msra.mxu0 %v1955_v8  ;;  %328 = vmatmul.bf16.gmra.mxu2 %v1629_v9 }
  0x65   :  { %660 = vmatpush.bf16.msra.mxu3 %v2068_v35  ;;  %750 = vmatpush.bf16.msra.mxu2 %v2036_v1 }
  0x67   :  { %568 = vmatmul.bf16.vlgmr.msrb.gmra.mxu0 %v1800_v38  ;;  %739 = vmatpush.bf16.msra.mxu1 %v2063_v29 }
  0x68   :  { %826 = vmatpush.bf16.msrb.mxu0 %v1964_v14 }
  0x69   :  { %813 = vmatpush.bf16.msrb.mxu3 %v1856_v7  ;;  %751 = vmatpush.bf16.msra.mxu2 %v2047_v15 }
  0x6b   :  { %740 = vmatpush.bf16.msra.mxu1 %v2071_v36 }
  0x6c   :  { %827 = vmatpush.bf16.msrb.mxu0 %v1983_v28 }
  0x6d   :  { %814 = vmatpush.bf16.msrb.mxu3 %v1859_v11  ;;  %752 = vmatpush.bf16.msra.mxu2 %v2060_v27 }
  0x70   :  { %828 = vmatpush.bf16.msrb.mxu0 %v2009_v42 }
  0x71   :  { %815 = vmatpush.bf16.msrb.mxu3 %v1868_v17  ;;  %753 = vmatpush.bf16.msra.mxu2 %v2068_v35 }
  0x74   :  { %829 = vmatpush.bf16.msrb.mxu0 %v2027_v55 }
  0x75   :  { %816 = vmatpush.bf16.msrb.mxu3 %v1877_v23 }
  0x78   :  { %830 = vmatpush.bf16.msrb.mxu0 %v2039_v2 }
  0x79   :  { %817 = vmatpush.bf16.msrb.mxu3 %v1898_v34 }
  0x7c   :  { %831 = vmatpush.bf16.msrb.mxu0 %v2050_v16 }
  0x7d   :  { %818 = vmatpush.bf16.msrb.mxu3 %v1919_v46 }
  0x80   :  { %832 = vmatpush.bf16.msrb.mxu0 %v2063_v29 }
  0x81   :  { %819 = vmatpush.bf16.msrb.mxu3 %v1940_v58 }
  0x84   :  { %833 = vmatpush.bf16.msrb.mxu0 %v2071_v36 }
  0x85   :  { %820 = vmatpush.bf16.msrb.mxu3 %v1955_v8 }
  0xa4   :  { %v256_v38 = vpop.f32.mrf.mxu0 }
  0xa5   :  { %v257_v50 = vadd.f32 %v256_v38, %v89_v43 }
  0xab   :  { %v543_v44 = vpop.f32.mrf.mxu3  ;;  %v285_v3 = vpop.f32.mrf.mxu1 }
  0xac   :  { %v258_v45 = vpop.f32.mrf.mxu0  ;;  %v544_v49 = vadd.f32 %v543_v44, %v2150_v47  ;;  %v286_v13 = vadd.f32 %v285_v3, %v2159_v63  ;;  %v2181_v3 = vperm.slane %v390_v40, 2 }
  0xad   :  { %v2152_v48 = vadd.f32 %v258_v45, %v89_v43 }
  0xae   :  { %v573_v53 = vadd.f32 %v544_v49, %v257_v50 }
  0xb0   :  { %v1578_v57 = vmul.f32 -1.442695, %v573_v53 }
  0xb2   :  { %1691 = vpow2.f32 %v1578_v57 }
  0xb3   :  { %v545_v51 = vpop.f32.mrf.mxu3 }
  0xb4   :  { %v261_v52 = vpop.f32.mrf.mxu0 }
  0xb5   :  { %v2155_v56 = vadd.f32 %v261_v52, %v89_v43 }
  0xb7   :  { %v314_v61 = vpop.f32.mrf.mxu2 }
  0xb8   :  { %v1692_v62 = vpop.eup %1691 }
  0xb9   :  { %v577_v6 = vadd.f32 1.0, %v1692_v62 }
  0xbb   :  { %1693 = vrcp.f32 %v577_v6  ;;  %v589_v62 = vand.u32 2147483648, %v577_v6  ;;  %vm583_vm1 = vweird.f32 %v577_v6 }
  0xbc   :  { %v263_v59 = vpop.f32.mrf.mxu0 }
  0xbd   :  { %v2157_v60 = vadd.f32 %v263_v59, %v89_v43 }
  0xbf   :  { %v316_v20 = vpop.f32.mrf.mxu2 }
  0xc0   :  { %v2170_v21 = vadd.f32 %v316_v20, %v2165_v12 }
  0xc1   :  { %v1694_v31 = vpop.eup %1693 }
  0xc2   :  { %v579_v33 = vmul.f32 %v1694_v31, %v577_v6  ;;  %vm584_vm0 = vweird.f32 %v1694_v31 }
  0xc3   :  { %vm585_vm2 = vmor %vm583_vm1, %vm584_vm0 }
  0xc4   :  { %v266_v0 = vpop.f32.mrf.mxu0  ;;  %v580_v44 = vsub.f32 1.0, %v579_v33 }
  0xc5   :  { %v2161_v4 = vadd.f32 %v266_v0, %v89_v43 }
  0xc6   :  { %v581_v50 = vmul.f32 %v1694_v31, %v580_v44 }
  0xc7   :  { %v319_v45 = vpop.f32.mrf.mxu2 }
  0xc8   :  { %v2177_v49 = vadd.f32 %v319_v45, %v2165_v12  ;;  %v582_v59 = vadd.f32 %v1694_v31, %v581_v50 }
  0xca   :  { %v586_v20 = vsel %vm585_vm2, %v1694_v31, %v582_v59 }
  0xcb   :  { %v556_v18 = vpop.f32.mrf.mxu3 }
  0xcc   :  { %v557_v19 = vadd.f32 %v556_v18, %v2163_v5  ;;  %v268_v24 = vpop.f32.mrf.mxu0 }
  0xcd   :  { %v2172_v30 = vadd.f32 %v268_v24, %v89_v43 }
  0xce   :  { %v593_v22 = vadd.f32 %v557_v19, %v286_v13  ;;  %v587_v13 = vand.u32 2147483647, %v577_v6 }
  0xcf   :  { %v321_v18 = vpop.f32.mrf.mxu2 }
  0xd0   :  { %v1579_v25 = vmul.f32 -1.442695, %v593_v22  ;;  %v2184_v19 = vadd.f32 %v321_v18, %v2165_v12  ;;  %vm588_vm3 = vcmp.eq.f32.partialorder %v587_v13, 8.507059e+37 }
  0xd2   :  { %1695 = vpow2.f32 %v1579_v25  ;;  %v315_v25 = vadd.f32 %v314_v61, %v2165_v12 }
  0xd3   :  { %v558_v32 = vpop.f32.mrf.mxu3 }
  0xd4   :  { %v271_v37 = vpop.f32.mrf.mxu0 }
  0xd5   :  { %v2174_v38 = vadd.f32 %v271_v37, %v89_v43 }
  0xd7   :  { %2434 = vst [vmem:[#allocation8_spill] sm:$0xff] %v2174_v38  ;;  %v324_v45 = vpop.f32.mrf.mxu2 }
  0xd8   :  { %v1696_v9 = vpop.eup %1695  ;;  %v2189_v31 = vadd.f32 %v324_v45, %v2165_v12 }
  0xd9   :  { %v597_v39 = vadd.f32 1.0, %v1696_v9 }
  0xdb   :  { %1697 = vrcp.f32 %v597_v39  ;;  %vm603_vm4 = vweird.f32 %v597_v39  ;;  %v609_v6 = vand.u32 2147483648, %v597_v39  ;;  %v607_v9 = vand.u32 2147483647, %v597_v39 }
  0xdc   :  { %v273_v51 = vpop.f32.mrf.mxu0 }
  0xdd   :  { %v2179_v52 = vadd.f32 %v273_v51, %v89_v43  ;;  %v590_v43 = vor.u32 1.1754944e-38, %v589_v62  ;;  %v610_v51 = vor.u32 1.1754944e-38, %v609_v6  ;;  %vm608_vm7 = vcmp.eq.f32.partialorder %v607_v9, 8.507059e+37 }
  0xdf   :  { %2435 = vst [vmem:[#allocation9_spill] sm:$0xff] %v2179_v52  ;;  %v591_v33 = vsel %vm588_vm3, %v590_v43, %v586_v20  ;;  %v287_v43 = vpop.f32.mrf.mxu1 }
  0xe1   :  { %v1698_v53 = vpop.eup %1697 }
  0xe2   :  { %v599_v57 = vmul.f32 %v1698_v53, %v597_v39  ;;  %vm604_vm5 = vweird.f32 %v1698_v53 }
  0xe3   :  { %vm605_vm6 = vmor %vm603_vm4, %vm604_vm5 }
  0xe4   :  { %v600_v0 = vsub.f32 1.0, %v599_v57  ;;  %v569_v24 = vpop.f32.mrf.mxu0 }
  0xe5   :  { %v570_v32 = vadd.f32 %v569_v24, %v2181_v3 }
  0xe6   :  { %v601_v22 = vmul.f32 %v1698_v53, %v600_v0  ;;  %v326_v0 = vpop.f32.mrf.mxu2 }
  0xe7   :  { %v613_v40 = vmul.f32 %v591_v33, %v570_v32  ;;  %v2192_v20 = vadd.f32 %v326_v0, %v2165_v12 }
  0xe8   :  { %v602_v37 = vadd.f32 %v1698_v53, %v601_v22 }
  0xe9   :  { %v614_v44 = vadd.f32 %v613_v40, %v315_v25  ;;  %v2225_v25 = vpop.f32.mrf.mxu1 }
  0xea   :  { %v606_v50 = vsel %vm605_vm6, %v1698_v53, %v602_v37 }
  0xeb   :  { %1699 = vtanh.f32 %v614_v44  ;;  %v611_v57 = vsel %vm608_vm7, %v610_v51, %v606_v50 }
  0xec   :  { %v571_v61 = vpop.f32.mrf.mxu0  ;;  %v616_v59 = vsub.f32 1.0, %v611_v57  ;;  %v618_v18 = vmul.f32 0.0, %v611_v57  ;;  %v288_v57 = vadd.f32 %v287_v43, %v2159_v63 }
  0xee   :  { %v329_v22 = vpop.f32.mrf.mxu2 }
  0xef   :  { %v2200_v24 = vadd.f32 %v329_v22, %v2165_v12 }
  0xf1   :  { %v1700_v62 = vpop.eup %1699  ;;  %2436 = vst [vmem:[#allocation10_spill] sm:$0xff] %v2200_v24  ;;  %v2227_v32 = vpop.f32.mrf.mxu1 }
  0xf2   :  { %v617_v13 = vmul.f32 %v1700_v62, %v616_v59 }
  0xf4   :  { %v2194_v39 = vadd.f32 %v618_v18, %v617_v13 }
  0xf6   :  { %v626_v53 = vpack.c.bf16 %v2194_v39, %v2194_v39  ;;  %v2237_v9 = vpop.f32.mrf.mxu2 }
  0xf7   :  { %2438 = vst [vmem:[#allocation12_spill] sm:$0xff] %v2237_v9 }
  0xf8   :  { %635 = vmatmul.bf16.vlgmr.msrb.gmra.mxu1 %v626_v53  ;;  %648 = vmatmul.bf16.vlgmr.msrb.gmra.mxu2 %v626_v53 }
  0xf9   :  { %661 = vmatmul.bf16.vlgmr.msra.gmra.mxu3 %v626_v53  ;;  %839 = vmatpush.bf16.msrb.mxu1 %v1962_v10  ;;  %v2229_v33 = vpop.f32.mrf.mxu1 }
  0xfa   :  { %906 = vmatpush.bf16.msrb.mxu2 %v1856_v7  ;;  %919 = vmatpush.bf16.msra.mxu3 %v1964_v14 }
  0xfd   :  { %840 = vmatpush.bf16.msrb.mxu1 %v1980_v26 }
  0xfe   :  { %907 = vmatpush.bf16.msrb.mxu2 %v1859_v11  ;;  %920 = vmatpush.bf16.msra.mxu3 %v1983_v28 }
 0x101   :  { %841 = vmatpush.bf16.msrb.mxu1 %v2006_v41  ;;  %v2231_v37 = vpop.f32.mrf.mxu1 }
 0x102   :  { %908 = vmatpush.bf16.msrb.mxu2 %v1868_v17  ;;  %921 = vmatpush.bf16.msra.mxu3 %v2009_v42 }
 0x105   :  { %842 = vmatpush.bf16.msrb.mxu1 %v2024_v54 }
 0x106   :  { %909 = vmatpush.bf16.msrb.mxu2 %v1877_v23  ;;  %922 = vmatpush.bf16.msra.mxu3 %v2027_v55 }
 0x109   :  { %843 = vmatpush.bf16.msrb.mxu1 %v2036_v1  ;;  %v2233_v40 = vpop.f32.mrf.mxu1 }
 0x10a   :  { %910 = vmatpush.bf16.msrb.mxu2 %v1898_v34  ;;  %923 = vmatpush.bf16.msra.mxu3 %v2039_v2 }
 0x10d   :  { %844 = vmatpush.bf16.msrb.mxu1 %v2047_v15 }
 0x10e   :  { %911 = vmatpush.bf16.msrb.mxu2 %v1919_v46  ;;  %924 = vmatpush.bf16.msra.mxu3 %v2050_v16 }
 0x111   :  { %845 = vmatpush.bf16.msrb.mxu1 %v2060_v27  ;;  %v2235_v6 = vpop.f32.mrf.mxu1 }
 0x112   :  { %912 = vmatpush.bf16.msrb.mxu2 %v1940_v58  ;;  %925 = vmatpush.bf16.msra.mxu3 %v2063_v29  ;;  %2437 = vst [vmem:[#allocation11_spill] sm:$0xff] %v2235_v6 }
 0x115   :  { %846 = vmatpush.bf16.msrb.mxu1 %v2068_v35 }
 0x116   :  { %913 = vmatpush.bf16.msrb.mxu2 %v1955_v8  ;;  %926 = vmatpush.bf16.msra.mxu3 %v2071_v36 }
 0x175   :  { %v636_v44 = vpop.f32.mrf.mxu1 }
 0x176   :  { %v637_v45 = vadd.f32 %v636_v44, %v2150_v47 }
 0x178   :  { %v666_v50 = vadd.f32 %v637_v45, %v2152_v48 }
 0x17a   :  { %v1580_v51 = vmul.f32 -1.442695, %v666_v50 }
 0x17b   :  { %v649_v61 = vpop.f32.mrf.mxu2 }
 0x17c   :  { %1701 = vpow2.f32 %v1580_v51  ;;  %v650_v59 = vadd.f32 %v649_v61, %v2163_v5  ;;  %v662_v62 = vpop.f32.mrf.mxu3 }
 0x17d   :  { %v638_v0 = vpop.f32.mrf.mxu1 }
 0x17e   :  { %v686_v13 = vadd.f32 %v650_v59, %v288_v57 }
 0x180   :  { %v1581_v18 = vmul.f32 -1.442695, %v686_v13 }
 0x182   :  { %v1702_v53 = vpop.eup %1701  ;;  %1703 = vpow2.f32 %v1581_v18 }
 0x183   :  { %v670_v22 = vadd.f32 1.0, %v1702_v53  ;;  %v651_v9 = vpop.f32.mrf.mxu2 }
 0x184   :  { %v664_v12 = vpop.f32.mrf.mxu3 }
 0x185   :  { %1705 = vrcp.f32 %v670_v22  ;;  %v682_v43 = vand.u32 2147483648, %v670_v22  ;;  %v680_v61 = vand.u32 2147483647, %v670_v22  ;;  %vm676_vm9 = vweird.f32 %v670_v22 }
 0x186   :  { %v663_v12 = vadd.f32 %v662_v62, %v2181_v3 }
 0x187   :  { %v683_v59 = vor.u32 1.1754944e-38, %v682_v43  ;;  %vm681_vm11 = vcmp.eq.f32.partialorder %v680_v61, 8.507059e+37 }
 0x188   :  { %v1704_v44 = vpop.eup %1703 }
 0x189   :  { %v690_v52 = vadd.f32 1.0, %v1704_v44 }
 0x18b   :  { %v1706_v48 = vpop.eup %1705  ;;  %1707 = vrcp.f32 %v690_v52  ;;  %v700_v24 = vand.u32 2147483647, %v690_v52  ;;  %vm696_vm13 = vweird.f32 %v690_v52 }
 0x18c   :  { %v672_v45 = vmul.f32 %v1706_v48, %v670_v22  ;;  %vm677_vm8 = vweird.f32 %v1706_v48 }
 0x18d   :  { %vm678_vm10 = vmor %vm676_vm9, %vm677_vm8  ;;  %vm701_vm15 = vcmp.eq.f32.partialorder %v700_v24, 8.507059e+37 }
 0x18e   :  { %v673_v50 = vsub.f32 1.0, %v672_v45  ;;  %v702_v45 = vand.u32 2147483648, %v690_v52 }
 0x190   :  { %v674_v51 = vmul.f32 %v1706_v48, %v673_v50 }
 0x191   :  { %v1708_v6 = vpop.eup %1707 }
 0x192   :  { %v692_v0 = vmul.f32 %v1708_v6, %v690_v52  ;;  %v675_v57 = vadd.f32 %v1706_v48, %v674_v51  ;;  %vm697_vm12 = vweird.f32 %v1708_v6  ;;  %v703_v51 = vor.u32 1.1754944e-38, %v702_v45 }
 0x193   :  { %vm698_vm14 = vmor %vm696_vm13, %vm697_vm12  ;;  %v291_v52 = vadd.f32 %v2225_v25, %v2159_v63 }
 0x194   :  { %v693_v13 = vsub.f32 1.0, %v692_v0  ;;  %v679_v9 = vsel %vm678_vm10, %v1706_v48, %v675_v57 }
 0x195   :  { %v684_v18 = vsel %vm681_vm11, %v683_v59, %v679_v9 }
 0x196   :  { %v694_v53 = vmul.f32 %v1708_v6, %v693_v13  ;;  %v706_v44 = vmul.f32 %v684_v18, %v663_v12 }
 0x198   :  { %v707_v50 = vadd.f32 %v706_v44, %v2170_v21  ;;  %v695_v38 = vadd.f32 %v1708_v6, %v694_v53 }
 0x19a   :  { %1709 = vtanh.f32 %v707_v50  ;;  %v699_v22 = vsel %vm698_vm14, %v1708_v6, %v695_v38 }
 0x19b   :  { %v704_v43 = vsel %vm701_vm15, %v703_v51, %v699_v22 }
 0x19c   :  { %v709_v0 = vsub.f32 1.0, %v704_v43  ;;  %v711_v61 = vmul.f32 %v704_v43, %v2194_v39 }
 0x1a0   :  { %v1710_v62 = vpop.eup %1709 }
 0x1a1   :  { %v710_v48 = vmul.f32 %v1710_v62, %v709_v0 }
 0x1a3   :  { %v2246_v57 = vadd.f32 %v711_v61, %v710_v48 }
 0x1a5   :  { %v719_v59 = vpack.c.bf16 %v2246_v57, %v2246_v57 }
 0x1a7   :  { %728 = vmatmul.bf16.vlgmr.msra.gmra.mxu0 %v719_v59  ;;  %741 = vmatmul.bf16.vlgmr.msra.gmra.mxu1 %v719_v59 }
 0x1a8   :  { %754 = vmatmul.bf16.vlgmr.msra.gmra.mxu2 %v719_v59  ;;  %932 = vmatpush.bf16.msra.mxu0 %v1962_v10 }
 0x1a9   :  { %999 = vmatpush.bf16.msra.mxu1 %v1856_v7  ;;  %1012 = vmatpush.bf16.msra.mxu2 %v1964_v14 }
 0x1ac   :  { %933 = vmatpush.bf16.msra.mxu0 %v1980_v26 }
 0x1ad   :  { %1000 = vmatpush.bf16.msra.mxu1 %v1859_v11  ;;  %1013 = vmatpush.bf16.msra.mxu2 %v1983_v28 }
 0x1b0   :  { %934 = vmatpush.bf16.msra.mxu0 %v2006_v41 }
 0x1b1   :  { %1001 = vmatpush.bf16.msra.mxu1 %v1868_v17  ;;  %1014 = vmatpush.bf16.msra.mxu2 %v2009_v42 }
 0x1b4   :  { %935 = vmatpush.bf16.msra.mxu0 %v2024_v54 }
 0x1b5   :  { %1002 = vmatpush.bf16.msra.mxu1 %v1877_v23  ;;  %1015 = vmatpush.bf16.msra.mxu2 %v2027_v55 }
 0x1b8   :  { %936 = vmatpush.bf16.msra.mxu0 %v2036_v1 }
 0x1b9   :  { %1003 = vmatpush.bf16.msra.mxu1 %v1898_v34  ;;  %1016 = vmatpush.bf16.msra.mxu2 %v2039_v2 }
 0x1bc   :  { %937 = vmatpush.bf16.msra.mxu0 %v2047_v15 }
 0x1bd   :  { %1004 = vmatpush.bf16.msra.mxu1 %v1919_v46  ;;  %1017 = vmatpush.bf16.msra.mxu2 %v2050_v16 }
 0x1c0   :  { %938 = vmatpush.bf16.msra.mxu0 %v2060_v27 }
 0x1c1   :  { %1005 = vmatpush.bf16.msra.mxu1 %v1940_v58  ;;  %1018 = vmatpush.bf16.msra.mxu2 %v2063_v29 }
 0x1c4   :  { %939 = vmatpush.bf16.msra.mxu0 %v2068_v35 }
 0x1c5   :  { %1006 = vmatpush.bf16.msra.mxu1 %v1955_v8  ;;  %1019 = vmatpush.bf16.msra.mxu2 %v2071_v36 }
 0x224   :  { %v729_v21 = vpop.f32.mrf.mxu0  ;;  %v742_v38 = vpop.f32.mrf.mxu1 }
 0x225   :  { %v730_v39 = vadd.f32 %v729_v21, %v2150_v47  ;;  %v743_v24 = vadd.f32 %v742_v38, %v2163_v5 }
 0x227   :  { %v759_v6 = vadd.f32 %v730_v39, %v2155_v56  ;;  %v779_v13 = vadd.f32 %v743_v24, %v291_v52 }
 0x229   :  { %v1582_v12 = vmul.f32 -1.442695, %v759_v6  ;;  %v1583_v9 = vmul.f32 -1.442695, %v779_v13 }
 0x22b   :  { %1711 = vpow2.f32 %v1582_v12  ;;  %v755_v18 = vpop.f32.mrf.mxu2 }
 0x22c   :  { %1713 = vpow2.f32 %v1583_v9  ;;  %v731_v53 = vpop.f32.mrf.mxu0  ;;  %v744_v44 = vpop.f32.mrf.mxu1  ;;  %v756_v6 = vadd.f32 %v755_v18, %v2181_v3 }
 0x231   :  { %v1712_v45 = vpop.eup %1711 }
 0x232   :  { %v1714_v50 = vpop.eup %1713  ;;  %v763_v22 = vadd.f32 1.0, %v1712_v45 }
 0x233   :  { %v783_v51 = vadd.f32 1.0, %v1714_v50  ;;  %v757_v43 = vpop.f32.mrf.mxu2 }
 0x234   :  { %1715 = vrcp.f32 %v763_v22  ;;  %v775_v59 = vand.u32 2147483648, %v763_v22  ;;  %v773_v38 = vand.u32 2147483647, %v763_v22  ;;  %vm769_vm1 = vweird.f32 %v763_v22 }
 0x235   :  { %1717 = vrcp.f32 %v783_v51  ;;  %v795_v44 = vand.u32 2147483648, %v783_v51  ;;  %vm789_vm5 = vweird.f32 %v783_v51  ;;  %v793_v45 = vand.u32 2147483647, %v783_v51 }
 0x236   :  { %v776_v24 = vor.u32 1.1754944e-38, %v775_v59  ;;  %vm774_vm3 = vcmp.eq.f32.partialorder %v773_v38, 8.507059e+37 }
 0x237   :  { %vm794_vm7 = vcmp.eq.f32.partialorder %v793_v45, 8.507059e+37 }
 0x23a   :  { %v1716_v25 = vpop.eup %1715 }
 0x23b   :  { %v1718_v0 = vpop.eup %1717  ;;  %v765_v62 = vmul.f32 %v1716_v25, %v763_v22  ;;  %vm770_vm0 = vweird.f32 %v1716_v25 }
 0x23c   :  { %v785_v48 = vmul.f32 %v1718_v0, %v783_v51  ;;  %vm771_vm2 = vmor %vm769_vm1, %vm770_vm0  ;;  %vm790_vm4 = vweird.f32 %v1718_v0 }
 0x23d   :  { %v766_v56 = vsub.f32 1.0, %v765_v62  ;;  %vm791_vm6 = vmor %vm789_vm5, %vm790_vm4  ;;  %v796_v62 = vor.u32 1.1754944e-38, %v795_v44 }
 0x23e   :  { %v786_v61 = vsub.f32 1.0, %v785_v48 }
 0x23f   :  { %v767_v21 = vmul.f32 %v1716_v25, %v766_v56 }
 0x240   :  { %v787_v52 = vmul.f32 %v1718_v0, %v786_v61 }
 0x241   :  { %v768_v39 = vadd.f32 %v1716_v25, %v767_v21 }
 0x242   :  { %v788_v9 = vadd.f32 %v1718_v0, %v787_v52 }
 0x243   :  { %v772_v13 = vsel %vm771_vm2, %v1716_v25, %v768_v39 }
 0x244   :  { %v777_v12 = vsel %vm774_vm3, %v776_v24, %v772_v13  ;;  %v792_v43 = vsel %vm791_vm6, %v1718_v0, %v788_v9 }
 0x245   :  { %v799_v53 = vmul.f32 %v777_v12, %v756_v6  ;;  %v797_v22 = vsel %vm794_vm7, %v796_v62, %v792_v43 }
 0x246   :  { %v802_v48 = vsub.f32 1.0, %v797_v22  ;;  %v804_v25 = vmul.f32 %v797_v22, %v2246_v57  ;;  %v293_v57 = vadd.f32 %v2227_v32, %v2159_v63 }
 0x247   :  { %v800_v50 = vadd.f32 %v799_v53, %v2177_v49 }
 0x249   :  { %1719 = vtanh.f32 %v800_v50 }
 0x24f   :  { %v1720_v56 = vpop.eup %1719 }
 0x250   :  { %v803_v18 = vmul.f32 %v1720_v56, %v802_v48 }
 0x252   :  { %v2282_v61 = vadd.f32 %v804_v25, %v803_v18 }
 0x254   :  { %v812_v59 = vpack.c.bf16 %v2282_v61, %v2282_v61 }
 0x256   :  { %821 = vmatmul.bf16.vlgmr.msrb.gmra.mxu3 %v812_v59  ;;  %834 = vmatmul.bf16.vlgmr.msrb.gmra.mxu0 %v812_v59 }
 0x257   :  { %847 = vmatmul.bf16.vlgmr.msrb.gmra.mxu1 %v812_v59  ;;  %1025 = vmatpush.bf16.msrb.mxu3 %v1962_v10 }
 0x258   :  { %1092 = vmatpush.bf16.msrb.mxu0 %v1856_v7  ;;  %1105 = vmatpush.bf16.msrb.mxu1 %v1964_v14 }
 0x25b   :  { %1026 = vmatpush.bf16.msrb.mxu3 %v1980_v26 }
 0x25c   :  { %1093 = vmatpush.bf16.msrb.mxu0 %v1859_v11  ;;  %1106 = vmatpush.bf16.msrb.mxu1 %v1983_v28 }
 0x25f   :  { %1027 = vmatpush.bf16.msrb.mxu3 %v2006_v41 }
 0x260   :  { %1094 = vmatpush.bf16.msrb.mxu0 %v1868_v17  ;;  %1107 = vmatpush.bf16.msrb.mxu1 %v2009_v42 }
 0x263   :  { %1028 = vmatpush.bf16.msrb.mxu3 %v2024_v54 }
 0x264   :  { %1095 = vmatpush.bf16.msrb.mxu0 %v1877_v23  ;;  %1108 = vmatpush.bf16.msrb.mxu1 %v2027_v55 }
 0x267   :  { %1029 = vmatpush.bf16.msrb.mxu3 %v2036_v1 }
 0x268   :  { %1096 = vmatpush.bf16.msrb.mxu0 %v1898_v34  ;;  %1109 = vmatpush.bf16.msrb.mxu1 %v2039_v2 }
 0x26b   :  { %1030 = vmatpush.bf16.msrb.mxu3 %v2047_v15 }
 0x26c   :  { %1097 = vmatpush.bf16.msrb.mxu0 %v1919_v46  ;;  %1110 = vmatpush.bf16.msrb.mxu1 %v2050_v16 }
 0x26f   :  { %1031 = vmatpush.bf16.msrb.mxu3 %v2060_v27 }
 0x270   :  { %1098 = vmatpush.bf16.msrb.mxu0 %v1940_v58  ;;  %1111 = vmatpush.bf16.msrb.mxu1 %v2063_v29 }
 0x273   :  { %1032 = vmatpush.bf16.msrb.mxu3 %v2068_v35 }
 0x274   :  { %1099 = vmatpush.bf16.msrb.mxu0 %v1955_v8  ;;  %1112 = vmatpush.bf16.msrb.mxu1 %v2071_v36 }
 0x2d3   :  { %v835_v49 = vpop.f32.mrf.mxu0 }
 0x2d4   :  { %v836_v51 = vadd.f32 %v835_v49, %v2163_v5  ;;  %v848_v0 = vpop.f32.mrf.mxu1 }
 0x2d6   :  { %v872_v21 = vadd.f32 %v836_v51, %v293_v57  ;;  %v849_v51 = vadd.f32 %v848_v0, %v2181_v3 }
 0x2d8   :  { %v1585_v38 = vmul.f32 -1.442695, %v872_v21 }
 0x2d9   :  { %v822_v52 = vpop.f32.mrf.mxu3 }
 0x2da   :  { %1721 = vpow2.f32 %v1585_v38  ;;  %v823_v39 = vadd.f32 %v822_v52, %v2150_v47 }
 0x2db   :  { %v837_v24 = vpop.f32.mrf.mxu0 }
 0x2dc   :  { %v852_v6 = vadd.f32 %v823_v39, %v2157_v60  ;;  %v850_v13 = vpop.f32.mrf.mxu1 }
 0x2de   :  { %v1584_v12 = vmul.f32 -1.442695, %v852_v6 }
 0x2e0   :  { %v1722_v9 = vpop.eup %1721  ;;  %1723 = vpow2.f32 %v1584_v12 }
 0x2e1   :  { %v876_v53 = vadd.f32 1.0, %v1722_v9  ;;  %v824_v44 = vpop.f32.mrf.mxu3 }
 0x2e3   :  { %1725 = vrcp.f32 %v876_v53  ;;  %v888_v39 = vand.u32 2147483648, %v876_v53  ;;  %vm882_vm13 = vweird.f32 %v876_v53  ;;  %v886_v6 = vand.u32 2147483647, %v876_v53 }
 0x2e5   :  { %v889_v9 = vor.u32 1.1754944e-38, %v888_v39  ;;  %vm887_vm15 = vcmp.eq.f32.partialorder %v886_v6, 8.507059e+37 }
 0x2e6   :  { %v1724_v32 = vpop.eup %1723 }
 0x2e7   :  { %v856_v45 = vadd.f32 1.0, %v1724_v32 }
 0x2e9   :  { %1727 = vrcp.f32 %v856_v45  ;;  %v1726_v50 = vpop.eup %1725  ;;  %v868_v18 = vand.u32 2147483648, %v856_v45  ;;  %v866_v60 = vand.u32 2147483647, %v856_v45  ;;  %vm862_vm9 = vweird.f32 %v856_v45 }
 0x2ea   :  { %v878_v43 = vmul.f32 %v1726_v50, %v876_v53  ;;  %vm883_vm12 = vweird.f32 %v1726_v50 }
 0x2eb   :  { %v869_v57 = vor.u32 1.1754944e-38, %v868_v18  ;;  %vm867_vm11 = vcmp.eq.f32.partialorder %v866_v60, 8.507059e+37  ;;  %vm884_vm14 = vmor %vm882_vm13, %vm883_vm12 }
 0x2ec   :  { %v879_v48 = vsub.f32 1.0, %v878_v43 }
 0x2ee   :  { %v880_v59 = vmul.f32 %v1726_v50, %v879_v48 }
 0x2ef   :  { %v1728_v62 = vpop.eup %1727 }
 0x2f0   :  { %v858_v22 = vmul.f32 %v1728_v62, %v856_v45  ;;  %vm863_vm8 = vweird.f32 %v1728_v62  ;;  %v881_v52 = vadd.f32 %v1726_v50, %v880_v59 }
 0x2f1   :  { %vm864_vm10 = vmor %vm862_vm9, %vm863_vm8 }
 0x2f2   :  { %v859_v56 = vsub.f32 1.0, %v858_v22  ;;  %v885_v12 = vsel %vm884_vm14, %v1726_v50, %v881_v52 }
 0x2f3   :  { %v890_v44 = vsel %vm887_vm15, %v889_v9, %v885_v12 }
 0x2f4   :  { %v860_v25 = vmul.f32 %v1728_v62, %v859_v56  ;;  %v895_v32 = vsub.f32 1.0, %v890_v44  ;;  %v897_v43 = vmul.f32 %v890_v44, %v2282_v61 }
 0x2f6   :  { %v861_v49 = vadd.f32 %v1728_v62, %v860_v25 }
 0x2f8   :  { %v865_v21 = vsel %vm864_vm10, %v1728_v62, %v861_v49 }
 0x2f9   :  { %v870_v38 = vsel %vm867_vm11, %v869_v57, %v865_v21 }
 0x2fa   :  { %v892_v24 = vmul.f32 %v870_v38, %v849_v51 }
 0x2fc   :  { %v893_v13 = vadd.f32 %v892_v24, %v2184_v19 }
 0x2fe   :  { %1729 = vtanh.f32 %v893_v13 }
 0x304   :  { %v1730_v45 = vpop.eup %1729 }
 0x305   :  { %v896_v0 = vmul.f32 %v1730_v45, %v895_v32 }
 0x307   :  { %v2318_v62 = vadd.f32 %v897_v43, %v896_v0 }
 0x309   :  { %v905_v22 = vpack.c.bf16 %v2318_v62, %v2318_v62 }
 0x30b   :  { %914 = vmatmul.bf16.vlgmr.msrb.gmra.mxu2 %v905_v22  ;;  %927 = vmatmul.bf16.vlgmr.msra.gmra.mxu3 %v905_v22 }
 0x30c   :  { %940 = vmatmul.bf16.vlgmr.msra.gmra.mxu0 %v905_v22  ;;  %1118 = vmatpush.bf16.msrb.mxu2 %v1962_v10 }
 0x30d   :  { %1185 = vmatpush.bf16.msra.mxu3 %v1856_v7  ;;  %1198 = vmatpush.bf16.msra.mxu0 %v1964_v14 }
 0x310   :  { %1119 = vmatpush.bf16.msrb.mxu2 %v1980_v26 }
 0x311   :  { %1186 = vmatpush.bf16.msra.mxu3 %v1859_v11  ;;  %1199 = vmatpush.bf16.msra.mxu0 %v1983_v28 }
 0x314   :  { %1120 = vmatpush.bf16.msrb.mxu2 %v2006_v41 }
 0x315   :  { %1187 = vmatpush.bf16.msra.mxu3 %v1868_v17  ;;  %1200 = vmatpush.bf16.msra.mxu0 %v2009_v42 }
 0x318   :  { %1121 = vmatpush.bf16.msrb.mxu2 %v2024_v54 }
 0x319   :  { %1188 = vmatpush.bf16.msra.mxu3 %v1877_v23  ;;  %1201 = vmatpush.bf16.msra.mxu0 %v2027_v55  ;;  %v296_v23 = vadd.f32 %v2229_v33, %v2159_v63 }
 0x31c   :  { %1122 = vmatpush.bf16.msrb.mxu2 %v2036_v1 }
 0x31d   :  { %1189 = vmatpush.bf16.msra.mxu3 %v1898_v34  ;;  %1202 = vmatpush.bf16.msra.mxu0 %v2039_v2 }
 0x320   :  { %1123 = vmatpush.bf16.msrb.mxu2 %v2047_v15 }
 0x321   :  { %1190 = vmatpush.bf16.msra.mxu3 %v1919_v46  ;;  %1203 = vmatpush.bf16.msra.mxu0 %v2050_v16 }
 0x324   :  { %1124 = vmatpush.bf16.msrb.mxu2 %v2060_v27 }
 0x325   :  { %1191 = vmatpush.bf16.msra.mxu3 %v1940_v58  ;;  %1204 = vmatpush.bf16.msra.mxu0 %v2063_v29 }
 0x328   :  { %1125 = vmatpush.bf16.msrb.mxu2 %v2068_v35 }
 0x329   :  { %1192 = vmatpush.bf16.msra.mxu3 %v1955_v8  ;;  %1205 = vmatpush.bf16.msra.mxu0 %v2071_v36 }
 0x389   :  { %v941_v7 = vpop.f32.mrf.mxu0 }
 0x38a   :  { %v942_v57 = vadd.f32 %v941_v7, %v2181_v3 }
 0x38e   :  { %v915_v11 = vpop.f32.mrf.mxu2  ;;  %v928_v17 = vpop.f32.mrf.mxu3 }
 0x38f   :  { %v916_v34 = vadd.f32 %v915_v11, %v2150_v47  ;;  %v929_v46 = vadd.f32 %v928_v17, %v2163_v5 }
 0x391   :  { %v945_v58 = vadd.f32 %v916_v34, %v2161_v4  ;;  %v965_v14 = vadd.f32 %v929_v46, %v296_v23  ;;  %v943_v28 = vpop.f32.mrf.mxu0 }
 0x393   :  { %v1586_v42 = vmul.f32 -1.442695, %v945_v58  ;;  %v1587_v55 = vmul.f32 -1.442695, %v965_v14 }
 0x395   :  { %1731 = vpow2.f32 %v1586_v42 }
 0x396   :  { %1733 = vpow2.f32 %v1587_v55  ;;  %v917_v8 = vpop.f32.mrf.mxu2  ;;  %v930_v2 = vpop.f32.mrf.mxu3 }
 0x39b   :  { %v1732_v16 = vpop.eup %1731 }
 0x39c   :  { %v1734_v29 = vpop.eup %1733  ;;  %v949_v36 = vadd.f32 1.0, %v1732_v16 }
 0x39d   :  { %v969_v19 = vadd.f32 1.0, %v1734_v29 }
 0x39e   :  { %1735 = vrcp.f32 %v949_v36  ;;  %v961_v4 = vand.u32 2147483648, %v949_v36  ;;  %v959_v25 = vand.u32 2147483647, %v949_v36  ;;  %vm955_vm1 = vweird.f32 %v949_v36 }
 0x39f   :  { %1737 = vrcp.f32 %v969_v19  ;;  %v981_v52 = vand.u32 2147483648, %v969_v19  ;;  %vm975_vm5 = vweird.f32 %v969_v19  ;;  %v979_v24 = vand.u32 2147483647, %v969_v19 }
 0x3a0   :  { %v962_v49 = vor.u32 1.1754944e-38, %v961_v4  ;;  %vm960_vm3 = vcmp.eq.f32.partialorder %v959_v25, 8.507059e+37 }
 0x3a1   :  { %v982_v12 = vor.u32 1.1754944e-38, %v981_v52  ;;  %vm980_vm7 = vcmp.eq.f32.partialorder %v979_v24, 8.507059e+37 }
 0x3a4   :  { %v1736_v33 = vpop.eup %1735 }
 0x3a5   :  { %v1738_v61 = vpop.eup %1737  ;;  %v951_v53 = vmul.f32 %v1736_v33, %v949_v36  ;;  %vm956_vm0 = vweird.f32 %v1736_v33 }
 0x3a6   :  { %v971_v50 = vmul.f32 %v1738_v61, %v969_v19  ;;  %vm957_vm2 = vmor %vm955_vm1, %vm956_vm0  ;;  %vm976_vm4 = vweird.f32 %v1738_v61 }
 0x3a7   :  { %v952_v48 = vsub.f32 1.0, %v951_v53  ;;  %vm977_vm6 = vmor %vm975_vm5, %vm976_vm4 }
 0x3a8   :  { %v972_v56 = vsub.f32 1.0, %v971_v50 }
 0x3a9   :  { %v953_v18 = vmul.f32 %v1736_v33, %v952_v48 }
 0x3aa   :  { %v973_v60 = vmul.f32 %v1738_v61, %v972_v56 }
 0x3ab   :  { %v954_v59 = vadd.f32 %v1736_v33, %v953_v18 }
 0x3ac   :  { %v974_v38 = vadd.f32 %v1738_v61, %v973_v60 }
 0x3ad   :  { %v958_v51 = vsel %vm957_vm2, %v1736_v33, %v954_v59 }
 0x3ae   :  { %v963_v21 = vsel %vm960_vm3, %v962_v49, %v958_v51  ;;  %v978_v13 = vsel %vm977_vm6, %v1738_v61, %v974_v38 }
 0x3af   :  { %v985_v39 = vmul.f32 %v963_v21, %v942_v57  ;;  %v983_v9 = vsel %vm980_vm7, %v982_v12, %v978_v13  ;;  %v2439_v12 = vld [vmem:[#allocation8_spill] sm:$0xff] }
 0x3b0   :  { %v988_v44 = vsub.f32 1.0, %v983_v9  ;;  %v990_v0 = vmul.f32 %v983_v9, %v2318_v62 }
 0x3b1   :  { %v986_v6 = vadd.f32 %v985_v39, %v2189_v31 }
 0x3b3   :  { %1739 = vtanh.f32 %v986_v6 }
 0x3b9   :  { %v1740_v32 = vpop.eup %1739 }
 0x3ba   :  { %v989_v45 = vmul.f32 %v1740_v32, %v988_v44 }
 0x3bc   :  { %v2354_v43 = vadd.f32 %v990_v0, %v989_v45 }
 0x3be   :  { %v998_v22 = vpack.c.bf16 %v2354_v43, %v2354_v43 }
 0x3c0   :  { %1007 = vmatmul.bf16.vlgmr.msra.gmra.mxu1 %v998_v22  ;;  %1020 = vmatmul.bf16.vlgmr.msra.gmra.mxu2 %v998_v22 }
 0x3c1   :  { %1033 = vmatmul.bf16.vlgmr.msrb.gmra.mxu3 %v998_v22  ;;  %1211 = vmatpush.bf16.msra.mxu1 %v1962_v10 }
 0x3c5   :  { %1212 = vmatpush.bf16.msra.mxu1 %v1980_v26  ;;  %v298_v26 = vadd.f32 %v2231_v37, %v2159_v63 }
 0x3c9   :  { %1213 = vmatpush.bf16.msra.mxu1 %v2006_v41 }
 0x3cd   :  { %1214 = vmatpush.bf16.msra.mxu1 %v2024_v54 }
 0x3d1   :  { %1215 = vmatpush.bf16.msra.mxu1 %v2036_v1 }
 0x3d5   :  { %1216 = vmatpush.bf16.msra.mxu1 %v2047_v15 }
 0x3d9   :  { %1217 = vmatpush.bf16.msra.mxu1 %v2060_v27 }
 0x3dd   :  { %1218 = vmatpush.bf16.msra.mxu1 %v2068_v35 }
 0x43d   :  { %v1008_v31 = vpop.f32.mrf.mxu1 }
 0x43e   :  { %v1009_v62 = vadd.f32 %v1008_v31, %v2150_v47 }
 0x440   :  { %v1038_v7 = vadd.f32 %v1009_v62, %v2172_v30 }
 0x442   :  { %v1588_v10 = vmul.f32 -1.442695, %v1038_v7 }
 0x443   :  { %v1021_v11 = vpop.f32.mrf.mxu2 }
 0x444   :  { %1741 = vpow2.f32 %v1588_v10  ;;  %v1022_v41 = vadd.f32 %v1021_v11, %v2163_v5  ;;  %v1034_v54 = vpop.f32.mrf.mxu3 }
 0x445   :  { %v1010_v1 = vpop.f32.mrf.mxu1  ;;  %v1035_v19 = vadd.f32 %v1034_v54, %v2181_v3 }
 0x446   :  { %v1058_v15 = vadd.f32 %v1022_v41, %v298_v26 }
 0x448   :  { %v1589_v17 = vmul.f32 -1.442695, %v1058_v15 }
 0x44a   :  { %v1742_v27 = vpop.eup %1741  ;;  %1743 = vpow2.f32 %v1589_v17 }
 0x44b   :  { %v1042_v35 = vadd.f32 1.0, %v1742_v27  ;;  %v1023_v23 = vpop.f32.mrf.mxu2 }
 0x44c   :  { %v1036_v34 = vpop.f32.mrf.mxu3 }
 0x44d   :  { %1745 = vrcp.f32 %v1042_v35  ;;  %v1054_v37 = vand.u32 2147483648, %v1042_v35  ;;  %v1052_v55 = vand.u32 2147483647, %v1042_v35  ;;  %vm1048_vm9 = vweird.f32 %v1042_v35 }
 0x44f   :  { %v1055_v29 = vor.u32 1.1754944e-38, %v1054_v37  ;;  %vm1053_vm11 = vcmp.eq.f32.partialorder %v1052_v55, 8.507059e+37 }
 0x450   :  { %v1744_v46 = vpop.eup %1743 }
 0x451   :  { %v1062_v30 = vadd.f32 1.0, %v1744_v46 }
 0x453   :  { %v1746_v58 = vpop.eup %1745  ;;  %1747 = vrcp.f32 %v1062_v30  ;;  %v1074_v48 = vand.u32 2147483648, %v1062_v30  ;;  %v1072_v4 = vand.u32 2147483647, %v1062_v30  ;;  %vm1068_vm13 = vweird.f32 %v1062_v30 }
 0x454   :  { %v1044_v14 = vmul.f32 %v1746_v58, %v1042_v35  ;;  %vm1049_vm8 = vweird.f32 %v1746_v58 }
 0x455   :  { %vm1050_vm10 = vmor %vm1048_vm9, %vm1049_vm8  ;;  %v1075_v60 = vor.u32 1.1754944e-38, %v1074_v48  ;;  %vm1073_vm15 = vcmp.eq.f32.partialorder %v1072_v4, 8.507059e+37  ;;  %v1685_v4 = vld [vmem:[%s2429_s5 + $0x38] sm:$0xff] }
 0x456   :  { %v1045_v28 = vsub.f32 1.0, %v1044_v14  ;;  %1344 = vmatpush.bf16.msra.mxu2 %v1685_v4 }
 0x458   :  { %v1046_v42 = vmul.f32 %v1746_v58, %v1045_v28 }
 0x459   :  { %v1748_v8 = vpop.eup %1747 }
 0x45a   :  { %v1064_v2 = vmul.f32 %v1748_v8, %v1062_v30  ;;  %v1047_v16 = vadd.f32 %v1746_v58, %v1046_v42  ;;  %vm1069_vm12 = vweird.f32 %v1748_v8 }
 0x45b   :  { %vm1070_vm14 = vmor %vm1068_vm13, %vm1069_vm12 }
 0x45c   :  { %v1065_v36 = vsub.f32 1.0, %v1064_v2  ;;  %v1051_v33 = vsel %vm1050_vm10, %v1746_v58, %v1047_v16 }
 0x45d   :  { %v1056_v61 = vsel %vm1053_vm11, %v1055_v29, %v1051_v33 }
 0x45e   :  { %v1066_v53 = vmul.f32 %v1748_v8, %v1065_v36  ;;  %v1078_v50 = vmul.f32 %v1056_v61, %v1035_v19 }
 0x460   :  { %v1079_v56 = vadd.f32 %v1078_v50, %v2192_v20  ;;  %v1067_v18 = vadd.f32 %v1748_v8, %v1066_v53  ;;  %v301_v20 = vadd.f32 %v2233_v40, %v2159_v63 }
 0x462   :  { %1749 = vtanh.f32 %v1079_v56  ;;  %v1071_v25 = vsel %vm1070_vm14, %v1748_v8, %v1067_v18  ;;  %v2440_v8 = vld [vmem:[#allocation10_spill] sm:$0xff]  ;;  %v1684_v56 = vld [vmem:[%s2429_s5 + $0x30] sm:$0xff] }
 0x463   :  { %v1076_v59 = vsel %vm1073_vm15, %v1075_v60, %v1071_v25  ;;  %1345 = vmatpush.bf16.msra.mxu2 %v1684_v56  ;;  %v2441_v25 = vld [vmem:[#allocation11_spill] sm:$0xff] }
 0x464   :  { %v1081_v49 = vsub.f32 1.0, %v1076_v59  ;;  %v1083_v21 = vmul.f32 %v1076_v59, %v2354_v43  ;;  %v303_v60 = vadd.f32 %v2441_v25, %v2159_v63  ;;  %v1681_v63 = vld [vmem:[%s2429_s5 + $0x18] sm:$0xff] }
 0x468   :  { %v1750_v57 = vpop.eup %1749 }
 0x469   :  { %v1082_v51 = vmul.f32 %v1750_v57, %v1081_v49  ;;  %v1683_v57 = vld [vmem:[%s2429_s5 + $0x28] sm:$0xff] }
 0x46a   :  { %1346 = vmatpush.bf16.msra.mxu2 %v1683_v57 }
 0x46b   :  { %v1084_v38 = vadd.f32 %v1083_v21, %v1082_v51 }
 0x46d   :  { %v1091_v52 = vpack.c.bf16 %v1084_v38, %v1084_v38 }
 0x46f   :  { %1100 = vmatmul.bf16.vlgmr.msrb.gmra.mxu0 %v1091_v52  ;;  %1113 = vmatmul.bf16.vlgmr.msrb.gmra.mxu1 %v1091_v52 }
 0x470   :  { %1126 = vmatmul.bf16.vlgmr.msrb.gmra.mxu2 %v1091_v52 }
 0x4ec   :  { %v1101_v39 = vpop.f32.mrf.mxu0  ;;  %v1114_v24 = vpop.f32.mrf.mxu1 }
 0x4ed   :  { %v1102_v6 = vadd.f32 %v1101_v39, %v2150_v47  ;;  %v1115_v13 = vadd.f32 %v1114_v24, %v2163_v5  ;;  %v2442_v24 = vld [vmem:[#allocation9_spill] sm:$0xff] }
 0x4ef   :  { %v1131_v9 = vadd.f32 %v1102_v6, %v2439_v12  ;;  %v1151_v44 = vadd.f32 %v1115_v13, %v301_v20  ;;  %v1680_v12 = vld [vmem:[%s2429_s5 + $0x10] sm:$0xff] }
 0x4f1   :  { %v1590_v32 = vmul.f32 -1.442695, %v1131_v9  ;;  %v1591_v45 = vmul.f32 -1.442695, %v1151_v44 }
 0x4f3   :  { %1751 = vpow2.f32 %v1590_v32  ;;  %v1127_v0 = vpop.f32.mrf.mxu2 }
 0x4f4   :  { %1753 = vpow2.f32 %v1591_v45  ;;  %v1103_v43 = vpop.f32.mrf.mxu0  ;;  %v1116_v22 = vpop.f32.mrf.mxu1  ;;  %v1128_v30 = vadd.f32 %v1127_v0, %v2181_v3  ;;  %v1678_v0 = vld [vmem:[%s2429_s5] sm:$0xff] }
 0x4f9   :  { %v1752_v31 = vpop.eup %1751 }
 0x4fa   :  { %v1754_v62 = vpop.eup %1753  ;;  %v1135_v7 = vadd.f32 1.0, %v1752_v31 }
 0x4fb   :  { %v1155_v10 = vadd.f32 1.0, %v1754_v62  ;;  %v1129_v11 = vpop.f32.mrf.mxu2 }
 0x4fc   :  { %1755 = vrcp.f32 %v1135_v7  ;;  %v1147_v17 = vand.u32 2147483648, %v1135_v7  ;;  %v1145_v35 = vand.u32 2147483647, %v1135_v7  ;;  %vm1141_vm1 = vweird.f32 %v1135_v7 }
 0x4fd   :  { %1757 = vrcp.f32 %v1155_v10  ;;  %v1167_v42 = vand.u32 2147483648, %v1155_v10  ;;  %vm1161_vm5 = vweird.f32 %v1155_v10  ;;  %v1165_v55 = vand.u32 2147483647, %v1155_v10 }
 0x4fe   :  { %v1148_v46 = vor.u32 1.1754944e-38, %v1147_v17  ;;  %vm1146_vm3 = vcmp.eq.f32.partialorder %v1145_v35, 8.507059e+37 }
 0x4ff   :  { %v1168_v29 = vor.u32 1.1754944e-38, %v1167_v42  ;;  %vm1166_vm7 = vcmp.eq.f32.partialorder %v1165_v55, 8.507059e+37 }
 0x502   :  { %v1756_v40 = vpop.eup %1755 }
 0x503   :  { %v1758_v26 = vpop.eup %1757  ;;  %v1137_v41 = vmul.f32 %v1756_v40, %v1135_v7  ;;  %vm1142_vm0 = vweird.f32 %v1756_v40 }
 0x504   :  { %v1157_v54 = vmul.f32 %v1758_v26, %v1155_v10  ;;  %vm1143_vm2 = vmor %vm1141_vm1, %vm1142_vm0  ;;  %vm1162_vm4 = vweird.f32 %v1758_v26 }
 0x505   :  { %v1138_v1 = vsub.f32 1.0, %v1137_v41  ;;  %vm1163_vm6 = vmor %vm1161_vm5, %vm1162_vm4 }
 0x506   :  { %v1158_v15 = vsub.f32 1.0, %v1157_v54 }
 0x507   :  { %v1139_v27 = vmul.f32 %v1756_v40, %v1138_v1 }
 0x508   :  { %v1159_v23 = vmul.f32 %v1758_v26, %v1158_v15 }
 0x509   :  { %v1140_v34 = vadd.f32 %v1756_v40, %v1139_v27 }
 0x50a   :  { %v1160_v28 = vadd.f32 %v1758_v26, %v1159_v23 }
 0x50b   :  { %v1144_v58 = vsel %vm1143_vm2, %v1756_v40, %v1140_v34  ;;  %v2443_v34 = vld [vmem:[#allocation7_spill] sm:$0xff] }
 0x50c   :  { %v1149_v14 = vsel %vm1146_vm3, %v1148_v46, %v1144_v58  ;;  %v1164_v16 = vsel %vm1163_vm6, %v1758_v26, %v1160_v28  ;;  %v2444_v46 = vld [vmem:[#allocation12_spill] sm:$0xff] }
 0x50d   :  { %v1171_v37 = vmul.f32 %v1149_v14, %v1128_v30  ;;  %v1169_v36 = vsel %vm1166_vm7, %v1168_v29, %v1164_v16  ;;  %v332_v30 = vadd.f32 %v2444_v46, %v2443_v34 }
 0x50e   :  { %v1174_v19 = vsub.f32 1.0, %v1169_v36  ;;  %v1176_v53 = vmul.f32 %v1169_v36, %v1084_v38  ;;  %v1682_v38 = vld [vmem:[%s2429_s5 + $0x20] sm:$0xff] }
 0x50f   :  { %v1172_v2 = vadd.f32 %v1171_v37, %v2440_v8  ;;  %1347 = vmatpush.bf16.msra.mxu2 %v1682_v38 }
 0x511   :  { %1759 = vtanh.f32 %v1172_v2 }
 0x513   :  { %1348 = vmatpush.bf16.msra.mxu2 %v1681_v63 }
 0x517   :  { %v1760_v33 = vpop.eup %1759  ;;  %1349 = vmatpush.bf16.msra.mxu2 %v1680_v12 }
 0x518   :  { %v1175_v61 = vmul.f32 %v1760_v33, %v1174_v19  ;;  %v1690_v33 = vld [vmem:[%s2430_s6] ss:$0 sm:$0xff] }
 0x51a   :  { %v2381_v50 = vadd.f32 %v1176_v53, %v1175_v61 }
 0x51c   :  { %v1184_v48 = vpack.c.bf16 %v2381_v50, %v2381_v50 }
 0x51e   :  { %1193 = vmatmul.bf16.vlgmr.msra.gmra.mxu3 %v1184_v48  ;;  %1206 = vmatmul.bf16.vlgmr.msra.gmra.mxu0 %v1184_v48 }
 0x51f   :  { %1219 = vmatmul.bf16.vlgmr.msra.gmra.mxu1 %v1184_v48 }
 0x59b   :  { %v1207_v18 = vpop.f32.mrf.mxu0 }
 0x59c   :  { %v1208_v59 = vadd.f32 %v1207_v18, %v2163_v5  ;;  %v1220_v49 = vpop.f32.mrf.mxu1 }
 0x59d   :  { %v1221_v17 = vadd.f32 %v1220_v49, %v2181_v3 }
 0x59e   :  { %v1244_v51 = vadd.f32 %v1208_v59, %v303_v60 }
 0x5a0   :  { %v1593_v21 = vmul.f32 -1.442695, %v1244_v51 }
 0x5a1   :  { %v1194_v52 = vpop.f32.mrf.mxu3 }
 0x5a2   :  { %1761 = vpow2.f32 %v1593_v21  ;;  %v1195_v39 = vadd.f32 %v1194_v52, %v2150_v47  ;;  %v1679_v47 = vld [vmem:[%s2429_s5 + $0x8] sm:$0xff] }
 0x5a3   :  { %v1209_v5 = vpop.f32.mrf.mxu0  ;;  %1350 = vmatpush.bf16.msra.mxu2 %v1679_v47 }
 0x5a4   :  { %v1224_v20 = vadd.f32 %v1195_v39, %v2442_v24  ;;  %v1222_v6 = vpop.f32.mrf.mxu1 }
 0x5a6   :  { %v1592_v13 = vmul.f32 -1.442695, %v1224_v20 }
 0x5a7   :  { %1351 = vmatpush.bf16.msra.mxu2 %v1678_v0 }
 0x5a8   :  { %v1762_v9 = vpop.eup %1761  ;;  %1763 = vpow2.f32 %v1592_v13 }
 0x5a9   :  { %v1248_v44 = vadd.f32 1.0, %v1762_v9  ;;  %v1196_v32 = vpop.f32.mrf.mxu3 }
 0x5ab   :  { %1765 = vrcp.f32 %v1248_v44  ;;  %v1260_v58 = vand.u32 2147483648, %v1248_v44  ;;  %vm1254_vm13 = vweird.f32 %v1248_v44  ;;  %v1258_v28 = vand.u32 2147483647, %v1248_v44 }
 0x5ad   :  { %v1261_v55 = vor.u32 1.1754944e-38, %v1260_v58  ;;  %vm1259_vm15 = vcmp.eq.f32.partialorder %v1258_v28, 8.507059e+37 }
 0x5ae   :  { %v1764_v45 = vpop.eup %1763 }
 0x5af   :  { %v1228_v43 = vadd.f32 1.0, %v1764_v45 }
 0x5b1   :  { %1767 = vrcp.f32 %v1228_v43  ;;  %v1766_v22 = vpop.eup %1765  ;;  %v1240_v40 = vand.u32 2147483648, %v1228_v43  ;;  %v1238_v41 = vand.u32 2147483647, %v1228_v43  ;;  %vm1234_vm9 = vweird.f32 %v1228_v43 }
 0x5b2   :  { %v1250_v31 = vmul.f32 %v1766_v22, %v1248_v44  ;;  %vm1255_vm12 = vweird.f32 %v1766_v22 }
 0x5b3   :  { %v1241_v15 = vor.u32 1.1754944e-38, %v1240_v40  ;;  %vm1239_vm11 = vcmp.eq.f32.partialorder %v1238_v41, 8.507059e+37  ;;  %vm1256_vm14 = vmor %vm1254_vm13, %vm1255_vm12 }
 0x5b4   :  { %v1251_v10 = vsub.f32 1.0, %v1250_v31 }
 0x5b6   :  { %v1252_v54 = vmul.f32 %v1766_v22, %v1251_v10 }
 0x5b7   :  { %v1768_v62 = vpop.eup %1767 }
 0x5b8   :  { %v1230_v7 = vmul.f32 %v1768_v62, %v1228_v43  ;;  %vm1235_vm8 = vweird.f32 %v1768_v62  ;;  %v1253_v23 = vadd.f32 %v1766_v22, %v1252_v54 }
 0x5b9   :  { %vm1236_vm10 = vmor %vm1234_vm9, %vm1235_vm8 }
 0x5ba   :  { %v1231_v11 = vsub.f32 1.0, %v1230_v7  ;;  %v1257_v42 = vsel %vm1256_vm14, %v1766_v22, %v1253_v23 }
 0x5bb   :  { %v1262_v8 = vsel %vm1259_vm15, %v1261_v55, %v1257_v42 }
 0x5bc   :  { %v1232_v26 = vmul.f32 %v1768_v62, %v1231_v11  ;;  %v1267_v3 = vsub.f32 1.0, %v1262_v8  ;;  %v1269_v29 = vmul.f32 %v1262_v8, %v2381_v50 }
 0x5be   :  { %v1233_v1 = vadd.f32 %v1768_v62, %v1232_v26 }
 0x5c0   :  { %v1237_v27 = vsel %vm1236_vm10, %v1768_v62, %v1233_v1 }
 0x5c1   :  { %v1242_v35 = vsel %vm1239_vm11, %v1241_v15, %v1237_v27 }
 0x5c2   :  { %v1264_v14 = vmul.f32 %v1242_v35, %v1221_v17 }
 0x5c4   :  { %v1265_v37 = vadd.f32 %v1264_v14, %v332_v30 }
 0x5c6   :  { %1769 = vtanh.f32 %v1265_v37 }
 0x5cc   :  { %v1770_v2 = vpop.eup %1769 }
 0x5cd   :  { %v1268_v16 = vmul.f32 %v1770_v2, %v1267_v3 }
 0x5cf   :  { %v1270_v36 = vadd.f32 %v1269_v29, %v1268_v16 }
 0x5d1   :  { %v1275_v19 = vpack.c.bf16 %v1270_v36, %v1270_v36 }
 0x5d3   :  { %1352 = vmatmul.bf16.vlgmr.msra.gmra.mxu2 %v1275_v19 }
 0x656   :  { %v1353_v61 = vpop.f32.mrf.mxu2 }
 0x657   :  { %v1354_v53 = vadd.f32 %v1690_v33, %v1353_v61 }
 0x659   :  { %1357 = vst [vmem:[%s2431_s7] sm:$0xff] %v1354_v53 }
 0x65e   :  { %v1355_v48 = vpop.f32.mrf.mxu2 }
 0x65f   :  { %1362 = vsyncpa [#allocation5], 1 }

</bundles_post_ra>
